<compile_context>
chip_gen: v6e
topology: v6e:2x2x1
jax: 0.10.0
libtpu: 0.0.40
codegen_flags: <defaults>
</compile_context>

<pallas_src>
import jax
import jax.numpy as jnp
from jax.experimental import pallas as pl
from jax.experimental.pallas import tpu as pltpu

B = 2
L_IN = 20          # input temporal length; upsample1 -> 80, upsample2 -> 160
C_IN = 512
C_MID = 512
C_HID = 256
N_CLS = 5
L1 = 80
L2 = 160
REP = L2 // L_IN   # total nearest-neighbour replication factor (4 * 2 = 8)


def decoder_edtcn_kernel(h_ref, w3_ref, b3_ref, w4_ref, b4_ref, wf_ref, bf_ref, o_ref):
    # h_ref: (B*L_IN, C_IN) f32, channels-last with the batch folded into rows.
    x = h_ref[...].astype(jnp.bfloat16)

    # conv3 (1x1 conv == channel matmul) + bias + relu, computed at L = L_IN.
    x = jnp.dot(x, w3_ref[...], preferred_element_type=jnp.float32) + b3_ref[...]
    x = jnp.maximum(x, 0.0)

    # conv4 (1x1) + bias + relu.
    x = jnp.dot(x.astype(jnp.bfloat16), w4_ref[...],
                preferred_element_type=jnp.float32) + b4_ref[...]
    x = jnp.maximum(x, 0.0)

    # fc (tiny; keep f32).
    logits = jnp.dot(x, wf_ref[...], preferred_element_type=jnp.float32) + bf_ref[...]

    # Legacy nn.Softmax() implicit dim on a 3-D tensor -> dim=0 (across the batch).
    per_b = [logits[b * L_IN:(b + 1) * L_IN] for b in range(B)]   # (L_IN, N_CLS) each
    m = per_b[0]
    for lb in per_b[1:]:
        m = jnp.maximum(m, lb)
    exps = [jnp.exp(lb - m) for lb in per_b]
    denom = exps[0]
    for e in exps[1:]:
        denom = denom + e
    inv = pl.reciprocal(denom, approx=True)

    # Nearest upsample 20 -> 160 == replicate each row REP times, applied only at
    # the output write (it commutes with everything above).
    for b in range(B):
        p = exps[b] * inv                                          # (L_IN, N_CLS)
        p = jnp.broadcast_to(p[:, None, :], (L_IN, REP, N_CLS))
        o_ref[b] = p.reshape(L2, N_CLS).astype(o_ref.dtype)


def decoder_edtcn_forward(h_ncl, params):
    """h_ncl: (B, 512, L_IN) in PyTorch NCL layout. Returns (B, 160, 5)."""
    w3, b3, w4, b4, wf, bf = params
    # -> channels-last, batch folded into the matmul M dimension.
    h2d = jnp.transpose(h_ncl, (0, 2, 1)).reshape(B * L_IN, C_IN)
    # bf16 weights for the two big MXU matmuls (f32 accumulation in-kernel).
    w3_bf = w3.astype(jnp.bfloat16)
    w4_bf = w4.astype(jnp.bfloat16)
    in_specs = [pl.BlockSpec(memory_space=pltpu.MemorySpace.VMEM) for _ in range(7)]
    return pl.pallas_call(
        decoder_edtcn_kernel,
        out_shape=jax.ShapeDtypeStruct((B, L2, N_CLS), jnp.float32),
        in_specs=in_specs,
        out_specs=pl.BlockSpec(memory_space=pltpu.MemorySpace.VMEM),
    )(h2d, w3_bf, b3, w4_bf, b4, wf, bf)


def init_params(key):
    """Deterministic init mirroring PyTorch's default uniform(-1/sqrt(fan_in), ...)."""
    ks = jax.random.split(key, 6)

    def u(k, shape, fan_in):
        bound = 1.0 / (fan_in ** 0.5)
        return jax.random.uniform(k, shape, jnp.float32, -bound, bound)

    # Conv/linear weights stored pre-transposed as (C_in, C_out) for x @ W.
    w3 = u(ks[0], (C_IN, C_MID), C_IN)
    b3 = u(ks[1], (1, C_MID), C_IN)
    w4 = u(ks[2], (C_MID, C_HID), C_MID)
    b4 = u(ks[3], (1, C_HID), C_MID)
    wf = u(ks[4], (C_HID, N_CLS), C_HID)
    bf = u(ks[5], (1, N_CLS), C_HID)
    return w3, b3, w4, b4, wf, bf


def reference_forward(h_ncl, params):
    """Pure-JAX f32 reference of the same (eval-mode) forward."""
    w3, b3, w4, b4, wf, bf = params
    x = jnp.transpose(h_ncl, (0, 2, 1))                  # (B, L_IN, 512)
    x = jnp.repeat(x, L1 // L_IN, axis=1)                # upsample1 -> (B, 80, 512)
    x = jnp.maximum(x @ w3 + b3, 0.0)                    # conv3 + relu
    x = jnp.repeat(x, L2 // L1, axis=1)                  # upsample2 -> (B, 160, 512)
    x = jnp.maximum(x @ w4 + b4, 0.0)                    # conv4 + relu
    logits = x @ wf + bf                                 # fc -> (B, 160, 5)
    return jax.nn.softmax(logits, axis=0)                # legacy implicit dim=0


if __name__ == "__main__":
    key = jax.random.PRNGKey(0)
    k_h, k_p = jax.random.split(key)
    h = jax.random.normal(k_h, (B, C_IN, L_IN), jnp.float32)   # PyTorch NCL input
    params = init_params(k_p)

    out = jax.jit(decoder_edtcn_forward)(h, params)
    out = jax.block_until_ready(out)

    ref = reference_forward(h, params)
    assert out.shape == (B, L2, N_CLS), out.shape
    # Tolerance relaxed vs the pure-f32 version: conv3/conv4 use bf16 MXU inputs
    # (f32 accumulation) and the softmax denom uses the EUP approx reciprocal.
    assert jnp.allclose(out, ref, rtol=2e-2, atol=1e-2), float(jnp.max(jnp.abs(out - ref)))

    print("KERNEL_OK")
</pallas_src>

<mosaic_0001>
module attributes {stable_mosaic.version = 11 : i64} {
  func.func @decoder_edtcn_kernel(%arg0: memref<40x512xf32, #tpu.memory_space<vmem>>, %arg1: memref<512x512xbf16, #tpu.memory_space<vmem>>, %arg2: memref<1x512xf32, #tpu.memory_space<vmem>>, %arg3: memref<512x256xbf16, #tpu.memory_space<vmem>>, %arg4: memref<1x256xf32, #tpu.memory_space<vmem>>, %arg5: memref<256x5xf32, #tpu.memory_space<vmem>>, %arg6: memref<1x5xf32, #tpu.memory_space<vmem>>, %arg7: memref<2x160x5xf32, #tpu.memory_space<vmem>>) attributes {dimension_semantics = [], scalar_prefetch = 0 : i64, scratch_operands = 0 : i64, tpu.core_type = #tpu.core_type<tc>} {
    %c0 = arith.constant 0 : index
    %c0_0 = arith.constant 0 : index
    %0 = vector.load %arg0[%c0, %c0_0] : memref<40x512xf32, #tpu.memory_space<vmem>>, vector<40x512xf32>
    %1 = arith.truncf %0 : vector<40x512xf32> to vector<40x512xbf16>
    %c0_1 = arith.constant 0 : index
    %c0_2 = arith.constant 0 : index
    %2 = vector.load %arg1[%c0_1, %c0_2] : memref<512x512xbf16, #tpu.memory_space<vmem>>, vector<512x512xbf16>
    %cst = arith.constant dense<0.000000e+00> : vector<40x512xf32>
    %3 = tpu.matmul %1, %2, %cst {dimension_numbers = #tpu.dot_dimension_numbers<[1], [0], [0], [1], [0, 0, 1, 1], [], []>} : vector<40x512xbf16>, vector<512x512xbf16>, vector<40x512xf32> -> vector<40x512xf32>
    %c0_3 = arith.constant 0 : index
    %c0_4 = arith.constant 0 : index
    %4 = vector.load %arg2[%c0_3, %c0_4] : memref<1x512xf32, #tpu.memory_space<vmem>>, vector<1x512xf32>
    %5 = vector.broadcast %4 : vector<1x512xf32> to vector<40x512xf32>
    %6 = arith.addf %3, %5 : vector<40x512xf32>
    %cst_5 = arith.constant 0.000000e+00 : f32
    %7 = vector.broadcast %cst_5 : f32 to vector<40x512xf32>
    %8 = arith.maximumf %6, %7 : vector<40x512xf32>
    %9 = arith.truncf %8 : vector<40x512xf32> to vector<40x512xbf16>
    %c0_6 = arith.constant 0 : index
    %c0_7 = arith.constant 0 : index
    %10 = vector.load %arg3[%c0_6, %c0_7] : memref<512x256xbf16, #tpu.memory_space<vmem>>, vector<512x256xbf16>
    %cst_8 = arith.constant dense<0.000000e+00> : vector<40x256xf32>
    %11 = tpu.matmul %9, %10, %cst_8 {dimension_numbers = #tpu.dot_dimension_numbers<[1], [0], [0], [1], [0, 0, 1, 1], [], []>} : vector<40x512xbf16>, vector<512x256xbf16>, vector<40x256xf32> -> vector<40x256xf32>
    %c0_9 = arith.constant 0 : index
    %c0_10 = arith.constant 0 : index
    %12 = vector.load %arg4[%c0_9, %c0_10] : memref<1x256xf32, #tpu.memory_space<vmem>>, vector<1x256xf32>
    %13 = vector.broadcast %12 : vector<1x256xf32> to vector<40x256xf32>
    %14 = arith.addf %11, %13 : vector<40x256xf32>
    %cst_11 = arith.constant 0.000000e+00 : f32
    %15 = vector.broadcast %cst_11 : f32 to vector<40x256xf32>
    %16 = arith.maximumf %14, %15 : vector<40x256xf32>
    %c0_12 = arith.constant 0 : index
    %c0_13 = arith.constant 0 : index
    %17 = vector.load %arg5[%c0_12, %c0_13] : memref<256x5xf32, #tpu.memory_space<vmem>>, vector<256x5xf32>
    %cst_14 = arith.constant dense<0.000000e+00> : vector<40x5xf32>
    %18 = tpu.matmul %16, %17, %cst_14 {dimension_numbers = #tpu.dot_dimension_numbers<[1], [0], [0], [1], [0, 0, 1, 1], [], []>} : vector<40x256xf32>, vector<256x5xf32>, vector<40x5xf32> -> vector<40x5xf32>
    %c0_15 = arith.constant 0 : index
    %c0_16 = arith.constant 0 : index
    %19 = vector.load %arg6[%c0_15, %c0_16] : memref<1x5xf32, #tpu.memory_space<vmem>>, vector<1x5xf32>
    %20 = vector.broadcast %19 : vector<1x5xf32> to vector<40x5xf32>
    %21 = arith.addf %18, %20 : vector<40x5xf32>
    %22 = vector.extract_strided_slice %21 {offsets = [0, 0], sizes = [20, 5], strides = [1, 1]} : vector<40x5xf32> to vector<20x5xf32>
    %23 = vector.extract_strided_slice %21 {offsets = [20, 0], sizes = [20, 5], strides = [1, 1]} : vector<40x5xf32> to vector<20x5xf32>
    %24 = arith.maximumf %22, %23 : vector<20x5xf32>
    %25 = arith.subf %22, %24 : vector<20x5xf32>
    %26 = math.exp %25 : vector<20x5xf32>
    %27 = arith.subf %23, %24 : vector<20x5xf32>
    %28 = math.exp %27 : vector<20x5xf32>
    %29 = arith.addf %26, %28 : vector<20x5xf32>
    %30 = tpu.reciprocal %29 {approx = true} : vector<20x5xf32> -> vector<20x5xf32>
    %31 = arith.mulf %26, %30 : vector<20x5xf32>
    %32 = vector.shape_cast %31 : vector<20x5xf32> to vector<20x1x5xf32>
    %33 = vector.shape_cast %32 : vector<20x1x5xf32> to vector<20x1x5xf32>
    %34 = vector.broadcast %33 : vector<20x1x5xf32> to vector<20x8x5xf32>
    %35 = vector.shape_cast %34 : vector<20x8x5xf32> to vector<160x5xf32>
    %c0_17 = arith.constant 0 : index
    %c0_18 = arith.constant 0 : index
    %c0_19 = arith.constant 0 : index
    %36 = vector.load %arg7[%c0_17, %c0_18, %c0_19] : memref<2x160x5xf32, #tpu.memory_space<vmem>>, vector<1x160x5xf32>
    %37 = vector.shape_cast %36 : vector<1x160x5xf32> to vector<160x5xf32>
    %38 = vector.shape_cast %35 : vector<160x5xf32> to vector<1x160x5xf32>
    tpu.vector_store %arg7[%c0_17, %c0_18, %c0_19], %38 {strides = array<i32>} : memref<2x160x5xf32, #tpu.memory_space<vmem>>, vector<1x160x5xf32>,
    %39 = arith.mulf %28, %30 : vector<20x5xf32>
    %40 = vector.shape_cast %39 : vector<20x5xf32> to vector<20x1x5xf32>
    %41 = vector.shape_cast %40 : vector<20x1x5xf32> to vector<20x1x5xf32>
    %42 = vector.broadcast %41 : vector<20x1x5xf32> to vector<20x8x5xf32>
    %43 = vector.shape_cast %42 : vector<20x8x5xf32> to vector<160x5xf32>
    %c1 = arith.constant 1 : index
    %c0_20 = arith.constant 0 : index
    %c0_21 = arith.constant 0 : index
    %44 = vector.load %arg7[%c1, %c0_20, %c0_21] : memref<2x160x5xf32, #tpu.memory_space<vmem>>, vector<1x160x5xf32>
    %45 = vector.shape_cast %44 : vector<1x160x5xf32> to vector<160x5xf32>
    %46 = vector.shape_cast %43 : vector<160x5xf32> to vector<1x160x5xf32>
    tpu.vector_store %arg7[%c1, %c0_20, %c0_21], %46 {strides = array<i32>} : memref<2x160x5xf32, #tpu.memory_space<vmem>>, vector<1x160x5xf32>,
    return
  }
}

</mosaic_0001>

<bundles_post_ra>
// kernel: decoder_edtcn_forward.1
= control target key start
LH: loop header
LB: loop body
LE: loop exit
PB: predicated region body
PF: predicated region fallthrough
CT: control target
= control target key end

     0   :  { %vm1784_vm0 = vcmask 1043456   ;;  %vm2070_vm1 = vcmask 39936   ;;  %s4061_s1 = inlined_call_operand.vmem [shape: bf16[512,512], index: 1, kind: input, shape index: {}]   ;;  %s4062_s0 = inlined_call_operand.vmem [shape: f32[40,512], index: 0, kind: input, shape index: {}]   ;;  %s4063_s3 = inlined_call_operand.vmem [shape: bf16[512,256], index: 3, kind: input, shape index: {}]   ;;  %s4064_s2 = inlined_call_operand.vmem [shape: f32[1,512], index: 2, kind: input, shape index: {}]   ;;  %s4065_s5 = inlined_call_operand.vmem [shape: f32[256,5], index: 5, kind: input, shape index: {}]   ;;  %s4066_s4 = inlined_call_operand.vmem [shape: f32[1,256], index: 4, kind: input, shape index: {}]   ;;  %s4067_s6 = inlined_call_operand.vmem [shape: f32[1,5], index: 6, kind: input, shape index: {}]   ;;  %s4068_s7 = inlined_call_operand.vmem [shape: f32[2,160,5], index: 7, kind: output, shape index: {}]  }
   0x1   :  { %v2649_v0 = vld [vmem:[%s4061_s1 + $0xe4] ss:$16 sps:$4 sm:$0xff]   ;;  %v2653_v2 = vld [vmem:[%s4061_s1 + $0xe0] ss:$16 sps:$4 sm:$0xff]   ;;  %v27_v46 = vld [vmem:[%s4062_s0 + $0x8] sm:$0xff] }
   0x2   :  { %v2651_v1 = vld [vmem:[%s4061_s1 + $0x2e4] ss:$16 sps:$4 sm:$0xff]   ;;  %848 = vmatprep.subr.bf16.mxu0 %v2649_v0  ;;  %v2654_v3 = vld [vmem:[%s4061_s1 + $0x2e0] ss:$16 sps:$4 sm:$0xff]   ;;  %v31_v47 = vld [vmem:[%s4062_s0 + $0x28] sm:$0xff] }
   0x3   :  { %909 = vmatprep.subr.bf16.mxu1 %v2651_v1  ;;  %v2655_v4 = vld [vmem:[%s4061_s1 + $0xc4] ss:$16 sps:$4 sm:$0xff]   ;;  %849 = vmatpush1.bf16.msra.mxu0 %v2653_v2  ;;  %v2659_v6 = vld [vmem:[%s4061_s1 + $0xc0] ss:$16 sps:$4 sm:$0xff]   ;;  %v29_v48 = vld [vmem:[%s4062_s0 + $0x18] sm:$0xff]  ;;  %v3155_v53 = vpack.c.bf16 %v31_v47, %v27_v46 }
   0x4   :  { %910 = vmatpush1.bf16.msra.mxu1 %v2654_v3  ;;  %v2657_v5 = vld [vmem:[%s4061_s1 + $0x2c4] ss:$16 sps:$4 sm:$0xff]   ;;  %850 = vmatprep.subr.bf16.mxu0 %v2655_v4  ;;  %v2660_v7 = vld [vmem:[%s4061_s1 + $0x2c0] ss:$16 sps:$4 sm:$0xff]   ;;  %v33_v49 = vld [vmem:[%s4062_s0 + $0x38] sm:$0xff] }
   0x5   :  { %911 = vmatprep.subr.bf16.mxu1 %v2657_v5  ;;  %v2661_v8 = vld [vmem:[%s4061_s1 + $0xa4] ss:$16 sps:$4 sm:$0xff]   ;;  %v2665_v10 = vld [vmem:[%s4061_s1 + $0xa0] ss:$16 sps:$4 sm:$0xff]   ;;  %v3157_v54 = vpack.c.bf16 %v33_v49, %v29_v48  ;;  %880 = vmatprep.mubr.bf16.mxu0 %v3155_v53  ;;  %v45_v47 = vld [vmem:[%s4062_s0 + $0x98] sm:$0xff] }
   0x6   :  { %v2663_v9 = vld [vmem:[%s4061_s1 + $0x2a4] ss:$16 sps:$4 sm:$0xff]   ;;  %v2666_v11 = vld [vmem:[%s4061_s1 + $0x2a0] ss:$16 sps:$4 sm:$0xff]   ;;  %v2780_v48 = vld [vmem:[%s4061_s1 + $0x24c] ss:$16 sps:$4 sm:$0xff]  }
   0x7   :  { %851 = vmatpush1.bf16.msra.mxu0 %v2659_v6  ;;  %v2667_v12 = vld [vmem:[%s4061_s1 + $0x84] ss:$16 sps:$4 sm:$0xff]   ;;  %v2671_v14 = vld [vmem:[%s4061_s1 + $0x80] ss:$16 sps:$4 sm:$0xff]   ;;  %941 = vmatprep.mubr.bf16.mxu1 %v3157_v54 }
   0x8   :  { %912 = vmatpush1.bf16.msra.mxu1 %v2660_v7  ;;  %852 = vmatprep.subr.bf16.mxu0 %v2661_v8  ;;  %v2669_v13 = vld [vmem:[%s4061_s1 + $0x284] ss:$16 sps:$4 sm:$0xff]   ;;  %v2672_v15 = vld [vmem:[%s4061_s1 + $0x280] ss:$16 sps:$4 sm:$0xff]  }
   0x9   :  { %913 = vmatprep.subr.bf16.mxu1 %v2663_v9  ;;  %v2673_v16 = vld [vmem:[%s4061_s1 + $0x64] ss:$16 sps:$4 sm:$0xff]   ;;  %v2677_v18 = vld [vmem:[%s4061_s1 + $0x60] ss:$16 sps:$4 sm:$0xff]  }
   0xa   :  { %v2675_v17 = vld [vmem:[%s4061_s1 + $0x264] ss:$16 sps:$4 sm:$0xff]   ;;  %v2678_v19 = vld [vmem:[%s4061_s1 + $0x260] ss:$16 sps:$4 sm:$0xff]  }
   0xb   :  { %853 = vmatpush1.bf16.msra.mxu0 %v2665_v10  ;;  %v2679_v20 = vld [vmem:[%s4061_s1 + $0x44] ss:$16 sps:$4 sm:$0xff]   ;;  %v2683_v22 = vld [vmem:[%s4061_s1 + $0x40] ss:$16 sps:$4 sm:$0xff]   ;;  %v2747_v10 = vld [vmem:[%s4061_s1 + $0xec] ss:$16 sps:$4 sm:$0xff]  }
   0xc   :  { %914 = vmatpush1.bf16.msra.mxu1 %v2666_v11  ;;  %854 = vmatprep.subr.bf16.mxu0 %v2667_v12  ;;  %v2681_v21 = vld [vmem:[%s4061_s1 + $0x244] ss:$16 sps:$4 sm:$0xff]   ;;  %v2684_v23 = vld [vmem:[%s4061_s1 + $0x240] ss:$16 sps:$4 sm:$0xff]   ;;  %v2750_v11 = vld [vmem:[%s4061_s1 + $0x2ec] ss:$16 sps:$4 sm:$0xff]  }
   0xd   :  { %915 = vmatprep.subr.bf16.mxu1 %v2669_v13  ;;  %v2685_v24 = vld [vmem:[%s4061_s1 + $0x24] ss:$16 sps:$4 sm:$0xff]   ;;  %v2689_v26 = vld [vmem:[%s4061_s1 + $0x20] ss:$16 sps:$4 sm:$0xff]  }
   0xe   :  { %v2687_v25 = vld [vmem:[%s4061_s1 + $0x224] ss:$16 sps:$4 sm:$0xff]   ;;  %v2690_v27 = vld [vmem:[%s4061_s1 + $0x220] ss:$16 sps:$4 sm:$0xff]  }
   0xf   :  { %855 = vmatpush1.bf16.msra.mxu0 %v2671_v14  ;;  %v2691_v28 = vld [vmem:[%s4061_s1 + $0x4] ss:$16 sps:$4 sm:$0xff]   ;;  %v2695_v30 = vld [vmem:[%s4061_s1] ss:$16 sps:$4 sm:$0xff]   ;;  %v2745_v14 = vld [vmem:[%s4061_s1 + $0xe8] ss:$16 sps:$4 sm:$0xff]  }
  0x10   :  { %916 = vmatpush1.bf16.msra.mxu1 %v2672_v15  ;;  %856 = vmatprep.subr.bf16.mxu0 %v2673_v16  ;;  %v2693_v29 = vld [vmem:[%s4061_s1 + $0x204] ss:$16 sps:$4 sm:$0xff]   ;;  %v2696_v31 = vld [vmem:[%s4061_s1 + $0x200] ss:$16 sps:$4 sm:$0xff]   ;;  %v2748_v15 = vld [vmem:[%s4061_s1 + $0x2e8] ss:$16 sps:$4 sm:$0xff]  }
  0x11   :  { %917 = vmatprep.subr.bf16.mxu1 %v2675_v17  ;;  %v2697_v32 = vld [vmem:[%s4061_s1 + $0x1e4] ss:$16 sps:$4 sm:$0xff]   ;;  %v2701_v34 = vld [vmem:[%s4061_s1 + $0x1e0] ss:$16 sps:$4 sm:$0xff]   ;;  %v2753_v16 = vld [vmem:[%s4061_s1 + $0xcc] ss:$16 sps:$4 sm:$0xff]  }
  0x12   :  { %v2699_v33 = vld [vmem:[%s4061_s1 + $0x3e4] ss:$16 sps:$4 sm:$0xff]   ;;  %v2702_v35 = vld [vmem:[%s4061_s1 + $0x3e0] ss:$16 sps:$4 sm:$0xff]   ;;  %v2756_v17 = vld [vmem:[%s4061_s1 + $0x2cc] ss:$16 sps:$4 sm:$0xff]  }
  0x13   :  { %857 = vmatpush1.bf16.msra.mxu0 %v2677_v18  ;;  %v2703_v36 = vld [vmem:[%s4061_s1 + $0x1c4] ss:$16 sps:$4 sm:$0xff]   ;;  %v2707_v38 = vld [vmem:[%s4061_s1 + $0x1c0] ss:$16 sps:$4 sm:$0xff]   ;;  %v2751_v18 = vld [vmem:[%s4061_s1 + $0xc8] ss:$16 sps:$4 sm:$0xff]  }
  0x14   :  { %918 = vmatpush1.bf16.msra.mxu1 %v2678_v19  ;;  %858 = vmatprep.subr.bf16.mxu0 %v2679_v20  ;;  %v2705_v37 = vld [vmem:[%s4061_s1 + $0x3c4] ss:$16 sps:$4 sm:$0xff]   ;;  %v2708_v39 = vld [vmem:[%s4061_s1 + $0x3c0] ss:$16 sps:$4 sm:$0xff]   ;;  %v2754_v19 = vld [vmem:[%s4061_s1 + $0x2c8] ss:$16 sps:$4 sm:$0xff]  }
  0x15   :  { %919 = vmatprep.subr.bf16.mxu1 %v2681_v21  ;;  %v2709_v40 = vld [vmem:[%s4061_s1 + $0x1a4] ss:$16 sps:$4 sm:$0xff]   ;;  %v2713_v42 = vld [vmem:[%s4061_s1 + $0x1a0] ss:$16 sps:$4 sm:$0xff]   ;;  %v2759_v20 = vld [vmem:[%s4061_s1 + $0xac] ss:$16 sps:$4 sm:$0xff]  }
  0x16   :  { %v2711_v41 = vld [vmem:[%s4061_s1 + $0x3a4] ss:$16 sps:$4 sm:$0xff]   ;;  %v2714_v43 = vld [vmem:[%s4061_s1 + $0x3a0] ss:$16 sps:$4 sm:$0xff]   ;;  %v2762_v21 = vld [vmem:[%s4061_s1 + $0x2ac] ss:$16 sps:$4 sm:$0xff]  }
  0x17   :  { %859 = vmatpush1.bf16.msra.mxu0 %v2683_v22  ;;  %v2715_v44 = vld [vmem:[%s4061_s1 + $0x184] ss:$16 sps:$4 sm:$0xff]   ;;  %v2719_v50 = vld [vmem:[%s4061_s1 + $0x180] ss:$16 sps:$4 sm:$0xff]   ;;  %v35_v22 = vld [vmem:[%s4062_s0 + $0x48] sm:$0xff] }
  0x18   :  { %920 = vmatpush1.bf16.msra.mxu1 %v2684_v23  ;;  %860 = vmatprep.subr.bf16.mxu0 %v2685_v24  ;;  %v2717_v45 = vld [vmem:[%s4061_s1 + $0x384] ss:$16 sps:$4 sm:$0xff]   ;;  %v2720_v51 = vld [vmem:[%s4061_s1 + $0x380] ss:$16 sps:$4 sm:$0xff]   ;;  %v39_v23 = vld [vmem:[%s4062_s0 + $0x68] sm:$0xff] }
  0x19   :  { %921 = vmatprep.subr.bf16.mxu1 %v2687_v25  ;;  %v2721_v52 = vld [vmem:[%s4061_s1 + $0x164] ss:$16 sps:$4 sm:$0xff]   ;;  %v2725_v56 = vld [vmem:[%s4061_s1 + $0x160] ss:$16 sps:$4 sm:$0xff]   ;;  %v3260_v24 = vpack.c.bf16 %v39_v23, %v35_v22  ;;  %v2825_v22 = vld [vmem:[%s4061_s1 + $0x14c] ss:$16 sps:$4 sm:$0xff]  }
  0x1a   :  { %v2723_v55 = vld [vmem:[%s4061_s1 + $0x364] ss:$16 sps:$4 sm:$0xff]   ;;  %v2726_v57 = vld [vmem:[%s4061_s1 + $0x360] ss:$16 sps:$4 sm:$0xff]   ;;  %v2828_v23 = vld [vmem:[%s4061_s1 + $0x34c] ss:$16 sps:$4 sm:$0xff]  }
  0x1b   :  { %861 = vmatpush1.bf16.msra.mxu0 %v2689_v26  ;;  %v2727_v58 = vld [vmem:[%s4061_s1 + $0x144] ss:$16 sps:$4 sm:$0xff]   ;;  %v2731_v60 = vld [vmem:[%s4061_s1 + $0x140] ss:$16 sps:$4 sm:$0xff]  }
  0x1c   :  { %922 = vmatpush1.bf16.msra.mxu1 %v2690_v27  ;;  %862 = vmatprep.subr.bf16.mxu0 %v2691_v28  ;;  %v2729_v59 = vld [vmem:[%s4061_s1 + $0x344] ss:$16 sps:$4 sm:$0xff]   ;;  %v2732_v61 = vld [vmem:[%s4061_s1 + $0x340] ss:$16 sps:$4 sm:$0xff]   ;;  %v37_v27 = vld [vmem:[%s4062_s0 + $0x58] sm:$0xff] }
  0x1d   :  { %923 = vmatprep.subr.bf16.mxu1 %v2693_v29  ;;  %v2733_v62 = vld [vmem:[%s4061_s1 + $0x124] ss:$16 sps:$4 sm:$0xff]   ;;  %v2737_v0 = vld [vmem:[%s4061_s1 + $0x120] ss:$16 sps:$4 sm:$0xff]   ;;  %v41_v29 = vld [vmem:[%s4062_s0 + $0x78] sm:$0xff] }
  0x1e   :  { %v2735_v63 = vld [vmem:[%s4061_s1 + $0x324] ss:$16 sps:$4 sm:$0xff]   ;;  %v2738_v1 = vld [vmem:[%s4061_s1 + $0x320] ss:$16 sps:$4 sm:$0xff]  }
  0x1f   :  { %863 = vmatpush1.bf16.msra.mxu0 %v2695_v30  ;;  %v2739_v2 = vld [vmem:[%s4061_s1 + $0x104] ss:$16 sps:$4 sm:$0xff]   ;;  %v2743_v4 = vld [vmem:[%s4061_s1 + $0x100] ss:$16 sps:$4 sm:$0xff]   ;;  %v2757_v30 = vld [vmem:[%s4061_s1 + $0xa8] ss:$16 sps:$4 sm:$0xff]  }
  0x20   :  { %924 = vmatpush1.bf16.msra.mxu1 %v2696_v31  ;;  %864 = vmatprep.subr.bf16.mxu0 %v2697_v32  ;;  %v2741_v3 = vld [vmem:[%s4061_s1 + $0x304] ss:$16 sps:$4 sm:$0xff]   ;;  %v2744_v5 = vld [vmem:[%s4061_s1 + $0x300] ss:$16 sps:$4 sm:$0xff]   ;;  %v2760_v31 = vld [vmem:[%s4061_s1 + $0x2a8] ss:$16 sps:$4 sm:$0xff]   ;;  %v3282_v32 = vpack.c.bf16 %v41_v29, %v37_v27 }
  0x21   :  { %925 = vmatprep.subr.bf16.mxu1 %v2699_v33  ;;  %v26_v6 = vld [vmem:[%s4062_s0] sm:$0xff]  ;;  %v28_v8 = vld [vmem:[%s4062_s0 + $0x10] sm:$0xff]  ;;  %v2765_v33 = vld [vmem:[%s4061_s1 + $0x8c] ss:$16 sps:$4 sm:$0xff]  }
  0x22   :  { %v30_v7 = vld [vmem:[%s4062_s0 + $0x20] sm:$0xff]  ;;  %v32_v9 = vld [vmem:[%s4062_s0 + $0x30] sm:$0xff]  ;;  %v2831_v27 = vld [vmem:[%s4061_s1 + $0x12c] ss:$16 sps:$4 sm:$0xff]  }
  0x23   :  { %865 = vmatpush2.bf16.msra.mxu0 %v2701_v34  ;;  %v3224_v12 = vpack.c.bf16 %v30_v7, %v26_v6  ;;  %v3226_v13 = vpack.c.bf16 %v32_v9, %v28_v8  ;;  %v34_v25 = vld [vmem:[%s4062_s0 + $0x40] sm:$0xff]  ;;  %v2768_v34 = vld [vmem:[%s4061_s1 + $0x28c] ss:$16 sps:$4 sm:$0xff]   ;;  %v2799_v6 = vld [vmem:[%s4061_s1 + $0x1c8] ss:$16 sps:$4 sm:$0xff]  }
  0x24   :  { %926 = vmatpush2.bf16.msra.mxu1 %v2702_v35  ;;  %866 = vmatprep.subr.bf16.mxu0 %v2703_v36  ;;  %v38_v26 = vld [vmem:[%s4062_s0 + $0x60] sm:$0xff]  ;;  %v36_v35 = vld [vmem:[%s4062_s0 + $0x50] sm:$0xff]  ;;  %v2802_v7 = vld [vmem:[%s4061_s1 + $0x3c8] ss:$16 sps:$4 sm:$0xff]  }
  0x25   :  { %927 = vmatprep.subr.bf16.mxu1 %v2705_v37  ;;  %v3271_v28 = vpack.c.bf16 %v38_v26, %v34_v25  ;;  %v40_v36 = vld [vmem:[%s4062_s0 + $0x70] sm:$0xff]  ;;  %v2763_v37 = vld [vmem:[%s4061_s1 + $0x88] ss:$16 sps:$4 sm:$0xff]   ;;  %v42_v46 = vld [vmem:[%s4062_s0 + $0x80] sm:$0xff] }
  0x26   :  { %v2807_v8 = vld [vmem:[%s4061_s1 + $0x1ac] ss:$16 sps:$4 sm:$0xff]   ;;  %v2823_v25 = vld [vmem:[%s4061_s1 + $0x148] ss:$16 sps:$4 sm:$0xff]  }
  0x27   :  { %867 = vmatpush2.bf16.msra.mxu0 %v2707_v38  ;;  %v2766_v38 = vld [vmem:[%s4061_s1 + $0x288] ss:$16 sps:$4 sm:$0xff]   ;;  %v2810_v9 = vld [vmem:[%s4061_s1 + $0x3ac] ss:$16 sps:$4 sm:$0xff]  }
  0x28   :  { %928 = vmatpush2.bf16.msra.mxu1 %v2708_v39  ;;  %868 = vmatprep.subr.bf16.mxu0 %v2709_v40  ;;  %v3305_v39 = vpack.c.bf16 %v40_v36, %v36_v35  ;;  %v2771_v40 = vld [vmem:[%s4061_s1 + $0x6c] ss:$16 sps:$4 sm:$0xff]   ;;  %v2826_v26 = vld [vmem:[%s4061_s1 + $0x348] ss:$16 sps:$4 sm:$0xff]  }
  0x29   :  { %929 = vmatprep.subr.bf16.mxu1 %v2711_v41  ;;  %v2774_v41 = vld [vmem:[%s4061_s1 + $0x26c] ss:$16 sps:$4 sm:$0xff]   ;;  %v2835_v35 = vld [vmem:[%s4061_s1 + $0x108] ss:$16 sps:$4 sm:$0xff]  }
  0x2a   :  { %v2834_v29 = vld [vmem:[%s4061_s1 + $0x32c] ss:$16 sps:$4 sm:$0xff]   ;;  %v2838_v36 = vld [vmem:[%s4061_s1 + $0x308] ss:$16 sps:$4 sm:$0xff]  }
  0x2b   :  { %869 = vmatpush2.bf16.msra.mxu0 %v2713_v42  ;;  %v2769_v42 = vld [vmem:[%s4061_s1 + $0x68] ss:$16 sps:$4 sm:$0xff]  }
  0x2c   :  { %930 = vmatpush2.bf16.msra.mxu1 %v2714_v43  ;;  %870 = vmatprep.subr.bf16.mxu0 %v2715_v44  ;;  %v2772_v43 = vld [vmem:[%s4061_s1 + $0x268] ss:$16 sps:$4 sm:$0xff]   ;;  %v2777_v44 = vld [vmem:[%s4061_s1 + $0x4c] ss:$16 sps:$4 sm:$0xff]  }
  0x2d   :  { %931 = vmatprep.subr.bf16.mxu1 %v2717_v45  ;;  %v43_v45 = vld [vmem:[%s4062_s0 + $0x88] sm:$0xff] }
  0x2e   :  { %v3335_v49 = vpack.c.bf16 %v43_v45, %v43_v45  ;;  %v2894_v45 = vld [vmem:[%s4063_s3 + $0x164] ss:$8 sps:$4 sm:$0xff]  }
  0x2f   :  { %871 = vmatpush2.bf16.msra.mxu0 %v2719_v50  ;;  %v3337_v50 = vpack.c.bf16 %v45_v47, %v45_v47  ;;  %v2892_v47 = vld [vmem:[%s4063_s3 + $0x160] ss:$8 sps:$4 sm:$0xff]  }
  0x30   :  { %932 = vmatpush2.bf16.msra.mxu1 %v2720_v51  ;;  %872 = vmatprep.subr.bf16.mxu0 %v2721_v52  ;;  %v3339_v51 = vpack.c.bf16 %v42_v46, %v42_v46  ;;  %v2775_v52 = vld [vmem:[%s4061_s1 + $0x48] ss:$16 sps:$4 sm:$0xff]  }
  0x31   :  { %933 = vmatprep.subr.bf16.mxu1 %v2723_v55  ;;  %v2778_v55 = vld [vmem:[%s4061_s1 + $0x248] ss:$16 sps:$4 sm:$0xff]  }
  0x32   :  { %v2856_v46 = vld [vmem:[%s4063_s3 + $0x20] ss:$8 sps:$4 sm:$0xff]  }
  0x33   :  { %873 = vmatpush2.bf16.msra.mxu0 %v2725_v56  ;;  %v44_v56 = vld [vmem:[%s4062_s0 + $0x90] sm:$0xff] }
  0x34   :  { %934 = vmatpush2.bf16.msra.mxu1 %v2726_v57  ;;  %874 = vmatprep.subr.bf16.mxu0 %v2727_v58  ;;  %v2783_v57 = vld [vmem:[%s4061_s1 + $0x2c] ss:$16 sps:$4 sm:$0xff]   ;;  %v3355_v58 = vpack.c.bf16 %v44_v56, %v44_v56  ;;  %v2862_v56 = vld [vmem:[%s4063_s3] ss:$8 sps:$4 sm:$0xff]  }
  0x35   :  { %935 = vmatprep.subr.bf16.mxu1 %v2729_v59  ;;  %v2786_v59 = vld [vmem:[%s4061_s1 + $0x22c] ss:$16 sps:$4 sm:$0xff]  }
  0x37   :  { %875 = vmatpush2.bf16.msra.mxu0 %v2731_v60  ;;  %v2781_v60 = vld [vmem:[%s4061_s1 + $0x28] ss:$16 sps:$4 sm:$0xff]  }
  0x38   :  { %936 = vmatpush2.bf16.msra.mxu1 %v2732_v61  ;;  %876 = vmatprep.subr.bf16.mxu0 %v2733_v62  ;;  %v2784_v61 = vld [vmem:[%s4061_s1 + $0x228] ss:$16 sps:$4 sm:$0xff]   ;;  %v2789_v62 = vld [vmem:[%s4061_s1 + $0xc] ss:$16 sps:$4 sm:$0xff]  }
  0x39   :  { %937 = vmatprep.subr.bf16.mxu1 %v2735_v63  ;;  %v2792_v63 = vld [vmem:[%s4061_s1 + $0x20c] ss:$16 sps:$4 sm:$0xff]  }
  0x3b   :  { %877 = vmatpush2.bf16.msra.mxu0 %v2737_v0  ;;  %v2787_v0 = vld [vmem:[%s4061_s1 + $0x8] ss:$16 sps:$4 sm:$0xff]  }
  0x3c   :  { %938 = vmatpush2.bf16.msra.mxu1 %v2738_v1  ;;  %878 = vmatprep.subr.bf16.mxu0 %v2739_v2  ;;  %v2798_v1 = vld [vmem:[%s4061_s1 + $0x3ec] ss:$16 sps:$4 sm:$0xff]   ;;  %v2793_v2 = vld [vmem:[%s4061_s1 + $0x1e8] ss:$16 sps:$4 sm:$0xff]  }
  0x3d   :  { %939 = vmatprep.subr.bf16.mxu1 %v2741_v3  ;;  %v2796_v3 = vld [vmem:[%s4061_s1 + $0x3e8] ss:$16 sps:$4 sm:$0xff]  }
  0x3f   :  { %879 = vmatpush2.bf16.msra.mxu0 %v2743_v4  ;;  %v2801_v4 = vld [vmem:[%s4061_s1 + $0x1cc] ss:$16 sps:$4 sm:$0xff]  }
  0x40   :  { %940 = vmatpush2.bf16.msra.mxu1 %v2744_v5  ;;  %970 = vmatprep.subr.bf16.mxu0 %v2747_v10  ;;  %v2804_v5 = vld [vmem:[%s4061_s1 + $0x3cc] ss:$16 sps:$4 sm:$0xff]   ;;  %v2805_v10 = vld [vmem:[%s4061_s1 + $0x1a8] ss:$16 sps:$4 sm:$0xff]  }
  0x41   :  { %1031 = vmatprep.subr.bf16.mxu1 %v2750_v11  ;;  %v2808_v11 = vld [vmem:[%s4061_s1 + $0x3a8] ss:$16 sps:$4 sm:$0xff]  }
  0x42   :  { %881 = vmatmul.mubr.bf16.vlgmr.msra.gmra.mxu0 %v3224_v12 }
  0x43   :  { %942 = vmatmul.mubr.bf16.vlgmr.msra.gmra.mxu1 %v3226_v13  ;;  %971 = vmatpush1.bf16.msra.mxu0 %v2745_v14  ;;  %v2813_v14 = vld [vmem:[%s4061_s1 + $0x18c] ss:$16 sps:$4 sm:$0xff]  }
  0x44   :  { %1032 = vmatpush1.bf16.msra.mxu1 %v2748_v15  ;;  %972 = vmatprep.subr.bf16.mxu0 %v2753_v16  ;;  %v2816_v15 = vld [vmem:[%s4061_s1 + $0x38c] ss:$16 sps:$4 sm:$0xff]   ;;  %v2811_v16 = vld [vmem:[%s4061_s1 + $0x188] ss:$16 sps:$4 sm:$0xff]  }
  0x45   :  { %1033 = vmatprep.subr.bf16.mxu1 %v2756_v17  ;;  %890 = vmatprep.mubr.bf16.mxu0 %v3260_v24  ;;  %v2814_v17 = vld [vmem:[%s4061_s1 + $0x388] ss:$16 sps:$4 sm:$0xff]  }
  0x46   :  { %951 = vmatprep.mubr.bf16.mxu1 %v3282_v32 }
  0x47   :  { %973 = vmatpush1.bf16.msra.mxu0 %v2751_v18  ;;  %v2819_v18 = vld [vmem:[%s4061_s1 + $0x16c] ss:$16 sps:$4 sm:$0xff]  }
  0x48   :  { %1034 = vmatpush1.bf16.msra.mxu1 %v2754_v19  ;;  %974 = vmatprep.subr.bf16.mxu0 %v2759_v20  ;;  %v2822_v19 = vld [vmem:[%s4061_s1 + $0x36c] ss:$16 sps:$4 sm:$0xff]   ;;  %v2817_v20 = vld [vmem:[%s4061_s1 + $0x168] ss:$16 sps:$4 sm:$0xff]  }
  0x49   :  { %1035 = vmatprep.subr.bf16.mxu1 %v2762_v21  ;;  %v2820_v21 = vld [vmem:[%s4061_s1 + $0x368] ss:$16 sps:$4 sm:$0xff]  }
  0x4a   :  { %891 = vmatmul.mubr.bf16.gmra.mxu0 %v3271_v28 }
  0x4b   :  { %975 = vmatpush1.bf16.msra.mxu0 %v2757_v30  ;;  %952 = vmatmul.mubr.bf16.gmra.mxu1 %v3305_v39  ;;  %v2829_v30 = vld [vmem:[%s4061_s1 + $0x128] ss:$16 sps:$4 sm:$0xff]  }
  0x4c   :  { %1036 = vmatpush1.bf16.msra.mxu1 %v2760_v31  ;;  %976 = vmatprep.subr.bf16.mxu0 %v2765_v33  ;;  %v2832_v31 = vld [vmem:[%s4061_s1 + $0x328] ss:$16 sps:$4 sm:$0xff]   ;;  %v2837_v33 = vld [vmem:[%s4061_s1 + $0x10c] ss:$16 sps:$4 sm:$0xff]  }
  0x4d   :  { %1037 = vmatprep.subr.bf16.mxu1 %v2768_v34  ;;  %900 = vmatprep.mubr.bf16.mxu0 %v3335_v49  ;;  %v2840_v34 = vld [vmem:[%s4061_s1 + $0x30c] ss:$16 sps:$4 sm:$0xff]  }
  0x4e   :  { %961 = vmatprep.mubr.bf16.mxu1 %v3337_v50 }
  0x4f   :  { %977 = vmatpush1.bf16.msra.mxu0 %v2763_v37  ;;  %v2843_v37 = vld [vmem:[%s4063_s3 + $0x74] ss:$8 sps:$4 sm:$0xff]  }
  0x50   :  { %1038 = vmatpush1.bf16.msra.mxu1 %v2766_v38  ;;  %978 = vmatprep.subr.bf16.mxu0 %v2771_v40  ;;  %v2841_v38 = vld [vmem:[%s4063_s3 + $0x70] ss:$8 sps:$4 sm:$0xff]   ;;  %v2846_v40 = vld [vmem:[%s4063_s3 + $0x64] ss:$8 sps:$4 sm:$0xff]  }
  0x51   :  { %1039 = vmatprep.subr.bf16.mxu1 %v2774_v41  ;;  %v2844_v41 = vld [vmem:[%s4063_s3 + $0x60] ss:$8 sps:$4 sm:$0xff]  }
  0x52   :  { %901 = vmatmul.mubr.bf16.gmra.mxu0 %v3339_v51 }
  0x53   :  { %979 = vmatpush1.bf16.msra.mxu0 %v2769_v42  ;;  %962 = vmatmul.mubr.bf16.gmra.mxu1 %v3355_v58  ;;  %v2849_v42 = vld [vmem:[%s4063_s3 + $0x54] ss:$8 sps:$4 sm:$0xff]  }
  0x54   :  { %1040 = vmatpush1.bf16.msra.mxu1 %v2772_v43  ;;  %980 = vmatprep.subr.bf16.mxu0 %v2777_v44  ;;  %v2858_v43 = vld [vmem:[%s4063_s3 + $0x24] ss:$8 sps:$4 sm:$0xff]   ;;  %v2889_v44 = vld [vmem:[%s4063_s3 + $0x170] ss:$8 sps:$4 sm:$0xff]  }
  0x55   :  { %1041 = vmatprep.subr.bf16.mxu1 %v2780_v48  ;;  %1002 = vmatprep.mubr.bf16.mxu0 %v3155_v53  ;;  %v2790_v53 = vld [vmem:[%s4061_s1 + $0x208] ss:$16 sps:$4 sm:$0xff]   ;;  %v2861_v48 = vld [vmem:[%s4063_s3 + $0x14] ss:$8 sps:$4 sm:$0xff]  }
  0x56   :  { %1063 = vmatprep.mubr.bf16.mxu1 %v3157_v54  ;;  %v2795_v54 = vld [vmem:[%s4061_s1 + $0x1ec] ss:$16 sps:$4 sm:$0xff]  }
  0x57   :  { %981 = vmatpush1.bf16.msra.mxu0 %v2775_v52  ;;  %v2864_v52 = vld [vmem:[%s4063_s3 + $0x4] ss:$8 sps:$4 sm:$0xff]  }
  0x58   :  { %1042 = vmatpush1.bf16.msra.mxu1 %v2778_v55  ;;  %982 = vmatprep.subr.bf16.mxu0 %v2783_v57  ;;  %v2900_v55 = vld [vmem:[%s4063_s3 + $0x144] ss:$8 sps:$4 sm:$0xff]   ;;  %v2898_v57 = vld [vmem:[%s4063_s3 + $0x140] ss:$8 sps:$4 sm:$0xff]  }
  0x59   :  { %1043 = vmatprep.subr.bf16.mxu1 %v2786_v59  ;;  %v2903_v59 = vld [vmem:[%s4063_s3 + $0x134] ss:$8 sps:$4 sm:$0xff]  }
  0x5b   :  { %983 = vmatpush1.bf16.msra.mxu0 %v2781_v60  ;;  %v2865_v60 = vld [vmem:[%s4063_s3 + $0xf0] ss:$8 sps:$4 sm:$0xff]  }
  0x5c   :  { %1044 = vmatpush1.bf16.msra.mxu1 %v2784_v61  ;;  %984 = vmatprep.subr.bf16.mxu0 %v2789_v62  ;;  %v2901_v61 = vld [vmem:[%s4063_s3 + $0x130] ss:$8 sps:$4 sm:$0xff]   ;;  %v2870_v62 = vld [vmem:[%s4063_s3 + $0xe4] ss:$8 sps:$4 sm:$0xff]  }
  0x5d   :  { %1045 = vmatprep.subr.bf16.mxu1 %v2792_v63  ;;  %v2906_v63 = vld [vmem:[%s4063_s3 + $0x124] ss:$8 sps:$4 sm:$0xff]  }
  0x5f   :  { %985 = vmatpush1.bf16.msra.mxu0 %v2787_v0  ;;  %v2868_v0 = vld [vmem:[%s4063_s3 + $0xe0] ss:$8 sps:$4 sm:$0xff]  }
  0x60   :  { %1046 = vmatpush1.bf16.msra.mxu1 %v2790_v53  ;;  %986 = vmatprep.subr.bf16.mxu0 %v2795_v54  ;;  %v2904_v53 = vld [vmem:[%s4063_s3 + $0x120] ss:$8 sps:$4 sm:$0xff]   ;;  %v2873_v54 = vld [vmem:[%s4063_s3 + $0xd4] ss:$8 sps:$4 sm:$0xff]  }
  0x61   :  { %1047 = vmatprep.subr.bf16.mxu1 %v2798_v1  ;;  %v2909_v1 = vld [vmem:[%s4063_s3 + $0x114] ss:$8 sps:$4 sm:$0xff]  }
  0x63   :  { %987 = vmatpush2.bf16.msra.mxu0 %v2793_v2  ;;  %v2871_v2 = vld [vmem:[%s4063_s3 + $0xd0] ss:$8 sps:$4 sm:$0xff]  }
  0x64   :  { %1048 = vmatpush2.bf16.msra.mxu1 %v2796_v3  ;;  %988 = vmatprep.subr.bf16.mxu0 %v2801_v4  ;;  %v2907_v3 = vld [vmem:[%s4063_s3 + $0x110] ss:$8 sps:$4 sm:$0xff]   ;;  %v2876_v4 = vld [vmem:[%s4063_s3 + $0xc4] ss:$8 sps:$4 sm:$0xff]  }
  0x65   :  { %1049 = vmatprep.subr.bf16.mxu1 %v2804_v5  ;;  %v2912_v5 = vld [vmem:[%s4063_s3 + $0x104] ss:$8 sps:$4 sm:$0xff]  }
  0x67   :  { %989 = vmatpush2.bf16.msra.mxu0 %v2799_v6  ;;  %v2874_v6 = vld [vmem:[%s4063_s3 + $0xc0] ss:$8 sps:$4 sm:$0xff]  }
  0x68   :  { %1050 = vmatpush2.bf16.msra.mxu1 %v2802_v7  ;;  %990 = vmatprep.subr.bf16.mxu0 %v2807_v8  ;;  %v2910_v7 = vld [vmem:[%s4063_s3 + $0x100] ss:$8 sps:$4 sm:$0xff]   ;;  %v2879_v8 = vld [vmem:[%s4063_s3 + $0xb4] ss:$8 sps:$4 sm:$0xff]  }
  0x69   :  { %1051 = vmatprep.subr.bf16.mxu1 %v2810_v9  ;;  %v2915_v9 = vld [vmem:[%s4063_s3 + $0x1f4] ss:$8 sps:$4 sm:$0xff]  }
  0x6b   :  { %991 = vmatpush2.bf16.msra.mxu0 %v2805_v10  ;;  %v2877_v10 = vld [vmem:[%s4063_s3 + $0xb0] ss:$8 sps:$4 sm:$0xff]  }
  0x6c   :  { %1052 = vmatpush2.bf16.msra.mxu1 %v2808_v11  ;;  %992 = vmatprep.subr.bf16.mxu0 %v2813_v14  ;;  %v2913_v11 = vld [vmem:[%s4063_s3 + $0x1f0] ss:$8 sps:$4 sm:$0xff]   ;;  %v2882_v14 = vld [vmem:[%s4063_s3 + $0xa4] ss:$8 sps:$4 sm:$0xff]  }
  0x6d   :  { %1053 = vmatprep.subr.bf16.mxu1 %v2816_v15  ;;  %v2918_v15 = vld [vmem:[%s4063_s3 + $0x1e4] ss:$8 sps:$4 sm:$0xff]  }
  0x6f   :  { %993 = vmatpush2.bf16.msra.mxu0 %v2811_v16  ;;  %v2880_v16 = vld [vmem:[%s4063_s3 + $0xa0] ss:$8 sps:$4 sm:$0xff]  }
  0x70   :  { %1054 = vmatpush2.bf16.msra.mxu1 %v2814_v17  ;;  %994 = vmatprep.subr.bf16.mxu0 %v2819_v18  ;;  %v2916_v17 = vld [vmem:[%s4063_s3 + $0x1e0] ss:$8 sps:$4 sm:$0xff]   ;;  %v2885_v18 = vld [vmem:[%s4063_s3 + $0x94] ss:$8 sps:$4 sm:$0xff]  }
  0x71   :  { %1055 = vmatprep.subr.bf16.mxu1 %v2822_v19  ;;  %v2921_v19 = vld [vmem:[%s4063_s3 + $0x1d4] ss:$8 sps:$4 sm:$0xff]  }
  0x73   :  { %995 = vmatpush2.bf16.msra.mxu0 %v2817_v20  ;;  %v2883_v20 = vld [vmem:[%s4063_s3 + $0x90] ss:$8 sps:$4 sm:$0xff]  }
  0x74   :  { %1056 = vmatpush2.bf16.msra.mxu1 %v2820_v21  ;;  %996 = vmatprep.subr.bf16.mxu0 %v2825_v22  ;;  %v2919_v21 = vld [vmem:[%s4063_s3 + $0x1d0] ss:$8 sps:$4 sm:$0xff]   ;;  %v2888_v22 = vld [vmem:[%s4063_s3 + $0x84] ss:$8 sps:$4 sm:$0xff]  }
  0x75   :  { %1057 = vmatprep.subr.bf16.mxu1 %v2828_v23  ;;  %v2924_v23 = vld [vmem:[%s4063_s3 + $0x1c4] ss:$8 sps:$4 sm:$0xff]  }
  0x77   :  { %997 = vmatpush2.bf16.msra.mxu0 %v2823_v25  ;;  %v2886_v25 = vld [vmem:[%s4063_s3 + $0x80] ss:$8 sps:$4 sm:$0xff]  }
  0x78   :  { %1058 = vmatpush2.bf16.msra.mxu1 %v2826_v26  ;;  %998 = vmatprep.subr.bf16.mxu0 %v2831_v27  ;;  %v2922_v26 = vld [vmem:[%s4063_s3 + $0x1c0] ss:$8 sps:$4 sm:$0xff]   ;;  %v2927_v27 = vld [vmem:[%s4063_s3 + $0x1b4] ss:$8 sps:$4 sm:$0xff]  }
  0x79   :  { %1059 = vmatprep.subr.bf16.mxu1 %v2834_v29  ;;  %v2925_v29 = vld [vmem:[%s4063_s3 + $0x1b0] ss:$8 sps:$4 sm:$0xff]  }
  0x7b   :  { %999 = vmatpush2.bf16.msra.mxu0 %v2829_v30  ;;  %v2930_v30 = vld [vmem:[%s4063_s3 + $0x1a4] ss:$8 sps:$4 sm:$0xff]  }
  0x7c   :  { %1060 = vmatpush2.bf16.msra.mxu1 %v2832_v31  ;;  %1000 = vmatprep.subr.bf16.mxu0 %v2837_v33  ;;  %v2928_v31 = vld [vmem:[%s4063_s3 + $0x1a0] ss:$8 sps:$4 sm:$0xff]   ;;  %v2933_v33 = vld [vmem:[%s4063_s3 + $0x194] ss:$8 sps:$4 sm:$0xff]  }
  0x7d   :  { %1061 = vmatprep.subr.bf16.mxu1 %v2840_v34  ;;  %v2931_v34 = vld [vmem:[%s4063_s3 + $0x190] ss:$8 sps:$4 sm:$0xff]  }
  0x7f   :  { %1001 = vmatpush2.bf16.msra.mxu0 %v2835_v35  ;;  %v2936_v35 = vld [vmem:[%s4063_s3 + $0x184] ss:$8 sps:$4 sm:$0xff]  }
  0x80   :  { %1062 = vmatpush2.bf16.msra.mxu1 %v2838_v36  ;;  %1520 = vmatprep.subr.bf16.mxu0 %v2843_v37  ;;  %v2934_v36 = vld [vmem:[%s4063_s3 + $0x180] ss:$8 sps:$4 sm:$0xff]   ;;  %v188_v37 = vlaneseq }
  0x82   :  { %1003 = vmatmul.mubr.bf16.vlgmr.msra.gmra.mxu0 %v3224_v12  ;;  %v2847_v12 = vld [vmem:[%s4063_s3 + $0x50] ss:$8 sps:$4 sm:$0xff]  }
  0x83   :  { %1064 = vmatmul.mubr.bf16.vlgmr.msra.gmra.mxu1 %v3226_v13  ;;  %1012 = vmatprep.mubr.bf16.mxu0 %v3260_v24  ;;  %v2852_v13 = vld [vmem:[%s4063_s3 + $0x44] ss:$8 sps:$4 sm:$0xff]   ;;  %v2850_v24 = vld [vmem:[%s4063_s3 + $0x40] ss:$8 sps:$4 sm:$0xff]  }
  0x84   :  { %1073 = vmatprep.mubr.bf16.mxu1 %v3282_v32  ;;  %1521 = vmatpush1.bf16.msra.mxu0 %v2841_v38  ;;  %v2855_v32 = vld [vmem:[%s4063_s3 + $0x34] ss:$8 sps:$4 sm:$0xff]   ;;  %v3680_v38 = vshrl.u32 %v188_v37, 7 }
  0x85   :  { %1522 = vmatprep.subr.bf16.mxu0 %v2846_v40 }
  0x86   :  { %v194_v40 = vsub.s32 1, %v3680_v38 }
  0x88   :  { %1523 = vmatpush1.bf16.msra.mxu0 %v2844_v41  ;;  %v3686_v41 = vld [vmem:[%s4064_s2] sm:$0xf] }
  0x89   :  { %1524 = vmatprep.subr.bf16.mxu0 %v2849_v42  ;;  %v3689_v42 = vsub.s32 0, %v3680_v38 }
  0x8a   :  { %1013 = vmatmul.mubr.bf16.gmra.mxu0 %v3271_v28  ;;  %v2853_v28 = vld [vmem:[%s4063_s3 + $0x30] ss:$8 sps:$4 sm:$0xff]  }
  0x8b   :  { %1074 = vmatmul.mubr.bf16.gmra.mxu1 %v3305_v39  ;;  %1022 = vmatprep.mubr.bf16.mxu0 %v3335_v49  ;;  %v2891_v39 = vld [vmem:[%s4063_s3 + $0x174] ss:$8 sps:$4 sm:$0xff]  }
  0x8c   :  { %1083 = vmatprep.mubr.bf16.mxu1 %v3337_v50  ;;  %1525 = vmatpush1.bf16.msra.mxu0 %v2847_v12  ;;  %v2897_v49 = vld [vmem:[%s4063_s3 + $0x154] ss:$8 sps:$4 sm:$0xff]   ;;  %v2859_v50 = vld [vmem:[%s4063_s3 + $0x10] ss:$8 sps:$4 sm:$0xff]   ;;  %v195_v12 = vrot.slane %v3686_v41, %v194_v40 }
  0x8d   :  { %1526 = vmatprep.subr.bf16.mxu0 %v2852_v13  ;;  %1581 = vmatprep.subr.bf16.mxu1 %v2891_v39  ;;  %v191_v13 = vrot.slane %v3686_v41, %v3689_v42 }
  0x8e   :  { %1582 = vmatpush1.bf16.msra.mxu1 %v2889_v44 }
  0x8f   :  { %1583 = vmatprep.subr.bf16.mxu1 %v2894_v45 }
  0x90   :  { %1527 = vmatpush1.bf16.msra.mxu0 %v2850_v24 }
  0x91   :  { %1528 = vmatprep.subr.bf16.mxu0 %v2855_v32 }
  0x92   :  { %1023 = vmatmul.mubr.bf16.gmra.mxu0 %v3339_v51  ;;  %1584 = vmatpush1.bf16.msra.mxu1 %v2892_v47  ;;  %v2895_v51 = vld [vmem:[%s4063_s3 + $0x150] ss:$8 sps:$4 sm:$0xff]  }
  0x93   :  { %1084 = vmatmul.mubr.bf16.gmra.mxu1 %v3355_v58  ;;  %1585 = vmatprep.subr.bf16.mxu1 %v2897_v49  ;;  %v2867_v58 = vld [vmem:[%s4063_s3 + $0xf4] ss:$8 sps:$4 sm:$0xff]  }
  0x94   :  { %1529 = vmatpush1.bf16.msra.mxu0 %v2853_v28 }
  0x95   :  { %1530 = vmatprep.subr.bf16.mxu0 %v2858_v43 }
  0x96   :  { %1586 = vmatpush1.bf16.msra.mxu1 %v2895_v51 }
  0x97   :  { %1587 = vmatprep.subr.bf16.mxu1 %v2900_v55 }
  0x98   :  { %1531 = vmatpush1.bf16.msra.mxu0 %v2856_v46 }
  0x99   :  { %1532 = vmatprep.subr.bf16.mxu0 %v2861_v48 }
  0x9a   :  { %1588 = vmatpush1.bf16.msra.mxu1 %v2898_v57 }
  0x9b   :  { %1589 = vmatprep.subr.bf16.mxu1 %v2903_v59 }
  0x9c   :  { %1533 = vmatpush1.bf16.msra.mxu0 %v2859_v50 }
  0x9d   :  { %1534 = vmatprep.subr.bf16.mxu0 %v2864_v52 }
  0x9e   :  { %1590 = vmatpush1.bf16.msra.mxu1 %v2901_v61 }
  0x9f   :  { %1591 = vmatprep.subr.bf16.mxu1 %v2906_v63 }
  0xa0   :  { %1535 = vmatpush1.bf16.msra.mxu0 %v2862_v56 }
  0xa1   :  { %1536 = vmatprep.subr.bf16.mxu0 %v2867_v58 }
  0xa2   :  { %1592 = vmatpush1.bf16.msra.mxu1 %v2904_v53 }
  0xa3   :  { %1593 = vmatprep.subr.bf16.mxu1 %v2909_v1 }
  0xa4   :  { %1537 = vmatpush2.bf16.msra.mxu0 %v2865_v60 }
  0xa5   :  { %1538 = vmatprep.subr.bf16.mxu0 %v2870_v62 }
  0xa6   :  { %1594 = vmatpush1.bf16.msra.mxu1 %v2907_v3 }
  0xa7   :  { %1595 = vmatprep.subr.bf16.mxu1 %v2912_v5 }
  0xa8   :  { %1539 = vmatpush2.bf16.msra.mxu0 %v2868_v0 }
  0xa9   :  { %1540 = vmatprep.subr.bf16.mxu0 %v2873_v54 }
  0xaa   :  { %1596 = vmatpush1.bf16.msra.mxu1 %v2910_v7 }
  0xab   :  { %1597 = vmatprep.subr.bf16.mxu1 %v2915_v9 }
  0xac   :  { %1541 = vmatpush2.bf16.msra.mxu0 %v2871_v2 }
  0xad   :  { %1542 = vmatprep.subr.bf16.mxu0 %v2876_v4 }
  0xae   :  { %1598 = vmatpush2.bf16.msra.mxu1 %v2913_v11 }
  0xaf   :  { %1599 = vmatprep.subr.bf16.mxu1 %v2918_v15 }
  0xb0   :  { %1543 = vmatpush2.bf16.msra.mxu0 %v2874_v6 }
  0xb1   :  { %1544 = vmatprep.subr.bf16.mxu0 %v2879_v8 }
  0xb2   :  { %1600 = vmatpush2.bf16.msra.mxu1 %v2916_v17 }
  0xb3   :  { %1601 = vmatprep.subr.bf16.mxu1 %v2921_v19 }
  0xb4   :  { %1545 = vmatpush2.bf16.msra.mxu0 %v2877_v10 }
  0xb5   :  { %1546 = vmatprep.subr.bf16.mxu0 %v2882_v14 }
  0xb6   :  { %1602 = vmatpush2.bf16.msra.mxu1 %v2919_v21 }
  0xb7   :  { %1603 = vmatprep.subr.bf16.mxu1 %v2924_v23 }
  0xb8   :  { %1547 = vmatpush2.bf16.msra.mxu0 %v2880_v16 }
  0xb9   :  { %1548 = vmatprep.subr.bf16.mxu0 %v2885_v18 }
  0xba   :  { %1604 = vmatpush2.bf16.msra.mxu1 %v2922_v26 }
  0xbb   :  { %1605 = vmatprep.subr.bf16.mxu1 %v2927_v27 }
  0xbc   :  { %1549 = vmatpush2.bf16.msra.mxu0 %v2883_v20 }
  0xbd   :  { %1550 = vmatprep.subr.bf16.mxu0 %v2888_v22 }
  0xbe   :  { %1606 = vmatpush2.bf16.msra.mxu1 %v2925_v29 }
  0xbf   :  { %1607 = vmatprep.subr.bf16.mxu1 %v2930_v30 }
  0xc0   :  { %1551 = vmatpush2.bf16.msra.mxu0 %v2886_v25 }
  0xc2   :  { %1608 = vmatpush2.bf16.msra.mxu1 %v2928_v31 }
  0xc3   :  { %1609 = vmatprep.subr.bf16.mxu1 %v2933_v33 }
  0xc6   :  { %1610 = vmatpush2.bf16.msra.mxu1 %v2931_v34 }
  0xc7   :  { %1611 = vmatprep.subr.bf16.mxu1 %v2936_v35 }
  0xca   :  { %1612 = vmatpush2.bf16.msra.mxu1 %v2934_v36 }
 0x102   :  { %v882_v24 = vpop.f32.mrf.mxu0 }
 0x103   :  { %v943_v32 = vpop.f32.mrf.mxu1  ;;  %v883_v44 = vadd.f32 %v882_v24, %v191_v13 }
 0x104   :  { %v884_v28 = vpop.f32.mrf.mxu0 }
 0x105   :  { %v945_v39 = vpop.f32.mrf.mxu1  ;;  %v885_v43 = vadd.f32 %v884_v28, %v195_v12  ;;  %v944_v52 = vadd.f32 %v943_v32, %v883_v44  ;;  %v198_v28 = vsub.s32 2, %v3680_v38 }
 0x106   :  { %v886_v45 = vpop.f32.mrf.mxu0 }
 0x107   :  { %v947_v46 = vpop.f32.mrf.mxu1  ;;  %v887_v47 = vadd.f32 %v886_v45, %v191_v13  ;;  %v946_v49 = vadd.f32 %v945_v39, %v885_v43  ;;  %v1092_v53 = vmax.f32 %v944_v52, 0.0  ;;  %v199_v39 = vrot.slane %v3686_v41, %v198_v28 }
 0x108   :  { %v888_v48 = vpop.f32.mrf.mxu0 }
 0x109   :  { %v948_v50 = vadd.f32 %v947_v46, %v887_v47  ;;  %v889_v51 = vadd.f32 %v888_v48, %v195_v12  ;;  %v949_v55 = vpop.f32.mrf.mxu1  ;;  %v1093_v61 = vmax.f32 %v946_v49, 0.0 }
 0x10a   :  { %v892_v56 = vpop.f32.mrf.mxu0 }
 0x10b   :  { %v950_v57 = vadd.f32 %v949_v55, %v889_v51  ;;  %v893_v58 = vadd.f32 %v892_v56, %v191_v13  ;;  %v1096_v59 = vmax.f32 %v948_v50, 0.0  ;;  %v953_v0 = vpop.f32.mrf.mxu1 }
 0x10c   :  { %v894_v60 = vpop.f32.mrf.mxu0 }
 0x10d   :  { %v1097_v62 = vmax.f32 %v950_v57, 0.0  ;;  %v895_v63 = vadd.f32 %v894_v60, %v195_v12  ;;  %v954_v2 = vadd.f32 %v953_v0, %v893_v58  ;;  %v955_v4 = vpop.f32.mrf.mxu1  ;;  %v1112_v5 = vpack.c.bf16 %v1096_v59, %v1092_v53 }
 0x10e   :  { %v896_v54 = vpop.f32.mrf.mxu0 }
 0x10f   :  { %v1113_v1 = vpack.c.bf16 %v1097_v62, %v1093_v61  ;;  %v897_v3 = vadd.f32 %v896_v54, %v191_v13  ;;  %v956_v6 = vadd.f32 %v955_v4, %v895_v63  ;;  %v957_v9 = vpop.f32.mrf.mxu1  ;;  %v1100_v11 = vmax.f32 %v954_v2, 0.0 }
 0x110   :  { %v898_v7 = vpop.f32.mrf.mxu0 }
 0x111   :  { %1552 = vmatprep.mubr.bf16.mxu0 %v1113_v1  ;;  %v899_v8 = vadd.f32 %v898_v7, %v195_v12  ;;  %v958_v10 = vadd.f32 %v957_v9, %v897_v3  ;;  %v959_v14 = vpop.f32.mrf.mxu1  ;;  %v1101_v15 = vmax.f32 %v956_v6, 0.0 }
 0x112   :  { %1553 = vmatmul.mubr.bf16.vlgmr.msra.gmra.mxu0 %v1112_v5  ;;  %v902_v18 = vpop.f32.mrf.mxu0 }
 0x113   :  { %v1104_v16 = vmax.f32 %v958_v10, 0.0  ;;  %v960_v17 = vadd.f32 %v959_v14, %v899_v8  ;;  %v963_v19 = vpop.f32.mrf.mxu1  ;;  %v903_v21 = vadd.f32 %v902_v18, %v191_v13  ;;  %v202_v13 = vsub.s32 3, %v3680_v38 }
 0x114   :  { %v904_v23 = vpop.f32.mrf.mxu0 }
 0x115   :  { %v1105_v20 = vmax.f32 %v960_v17, 0.0  ;;  %v1116_v22 = vpack.c.bf16 %v1104_v16, %v1100_v11  ;;  %v965_v25 = vpop.f32.mrf.mxu1  ;;  %v905_v27 = vadd.f32 %v904_v23, %v195_v12  ;;  %v964_v29 = vadd.f32 %v963_v19, %v903_v21 }
 0x116   :  { %v906_v30 = vpop.f32.mrf.mxu0  ;;  %v203_v12 = vrot.slane %v3686_v41, %v202_v13 }
 0x117   :  { %v1117_v26 = vpack.c.bf16 %v1105_v20, %v1101_v15  ;;  %v967_v31 = vpop.f32.mrf.mxu1  ;;  %v966_v33 = vadd.f32 %v965_v25, %v905_v27  ;;  %v1108_v34 = vmax.f32 %v964_v29, 0.0 }
 0x118   :  { %v907_v35 = vpop.f32.mrf.mxu0 }
 0x119   :  { %1562 = vmatprep.mubr.bf16.mxu0 %v1117_v26  ;;  %v968_v36 = vpop.f32.mrf.mxu1  ;;  %v1109_v37 = vmax.f32 %v966_v33, 0.0  ;;  %v1120_v32 = vpack.c.bf16 %v1108_v34, %v1108_v34 }
 0x11a   :  { %1563 = vmatmul.mubr.bf16.gmra.mxu0 %v1116_v22 }
 0x11b   :  { %v1121_v24 = vpack.c.bf16 %v1109_v37, %v1109_v37 }
 0x11d   :  { %1572 = vmatprep.mubr.bf16.mxu0 %v1121_v24 }
 0x122   :  { %1573 = vmatmul.mubr.bf16.gmra.mxu0 %v1120_v32 }
 0x142   :  { %v1004_v43 = vpop.f32.mrf.mxu0 }
 0x143   :  { %v1065_v44 = vpop.f32.mrf.mxu1  ;;  %v1005_v48 = vadd.f32 %v1004_v43, %v199_v39  ;;  %v1667_v43 = vld [vmem:[%s4065_s5 + $0x78] sm:$0xff] }
 0x144   :  { %v1006_v45 = vpop.f32.mrf.mxu0 }
 0x145   :  { %v1067_v46 = vpop.f32.mrf.mxu1  ;;  %v1007_v47 = vadd.f32 %v1006_v45, %v203_v12  ;;  %v1066_v59 = vadd.f32 %v1065_v44, %v1005_v48  ;;  %v1682_v44 = vld [vmem:[%s4065_s5 + $0xf0] sm:$0xff]  ;;  %v1680_v48 = vld [vmem:[%s4065_s5 + $0xe0] sm:$0xff] }
 0x146   :  { %v1008_v49 = vpop.f32.mrf.mxu0  ;;  %v1666_v45 = vld [vmem:[%s4065_s5 + $0x70] sm:$0xff] }
 0x147   :  { %v1069_v50 = vpop.f32.mrf.mxu1  ;;  %v1009_v51 = vadd.f32 %v1008_v49, %v199_v39  ;;  %v1068_v56 = vadd.f32 %v1067_v46, %v1007_v47  ;;  %v1094_v2 = vmax.f32 %v1066_v59, 0.0  ;;  %v1681_v46 = vld [vmem:[%s4065_s5 + $0xe8] sm:$0xff]  ;;  %v1664_v49 = vld [vmem:[%s4065_s5 + $0x60] sm:$0xff] }
 0x148   :  { %v1010_v52 = vpop.f32.mrf.mxu0  ;;  %v1665_v47 = vld [vmem:[%s4065_s5 + $0x68] sm:$0xff]  ;;  %v1660_v59 = vld [vmem:[%s4065_s5 + $0x40] sm:$0xff] }
 0x149   :  { %v1071_v55 = vpop.f32.mrf.mxu1  ;;  %v1070_v57 = vadd.f32 %v1069_v50, %v1009_v51  ;;  %v1011_v58 = vadd.f32 %v1010_v52, %v203_v12  ;;  %v1095_v53 = vmax.f32 %v1068_v56, 0.0  ;;  %v1679_v50 = vld [vmem:[%s4065_s5 + $0xd8] sm:$0xff]  ;;  %v1678_v52 = vld [vmem:[%s4065_s5 + $0xd0] sm:$0xff]  ;;  %v1677_v56 = vld [vmem:[%s4065_s5 + $0xc8] sm:$0xff] }
 0x14a   :  { %v1014_v60 = vpop.f32.mrf.mxu0  ;;  %v1663_v51 = vld [vmem:[%s4065_s5 + $0x58] sm:$0xff] }
 0x14b   :  { %v1075_v61 = vpop.f32.mrf.mxu1  ;;  %v1072_v62 = vadd.f32 %v1071_v55, %v1011_v58  ;;  %v1098_v63 = vmax.f32 %v1070_v57, 0.0  ;;  %v1015_v3 = vadd.f32 %v1014_v60, %v199_v39  ;;  %v1662_v55 = vld [vmem:[%s4065_s5 + $0x50] sm:$0xff]  ;;  %v1661_v57 = vld [vmem:[%s4065_s5 + $0x48] sm:$0xff]  ;;  %v1676_v58 = vld [vmem:[%s4065_s5 + $0xc0] sm:$0xff] }
 0x14c   :  { %v1016_v41 = vpop.f32.mrf.mxu0  ;;  %v1675_v60 = vld [vmem:[%s4065_s5 + $0xb8] sm:$0xff] }
 0x14d   :  { %v1077_v0 = vpop.f32.mrf.mxu1  ;;  %v1099_v54 = vmax.f32 %v1072_v62, 0.0  ;;  %v1017_v1 = vadd.f32 %v1016_v41, %v203_v12  ;;  %v1114_v8 = vpack.c.bf16 %v1098_v63, %v1094_v2  ;;  %v1076_v16 = vadd.f32 %v1075_v61, %v1015_v3  ;;  %v1659_v61 = vld [vmem:[%s4065_s5 + $0x38] sm:$0xff]  ;;  %v1674_v62 = vld [vmem:[%s4065_s5 + $0xb0] sm:$0xff]  ;;  %v1673_v41 = vld [vmem:[%s4065_s5 + $0xa8] sm:$0xff] }
 0x14e   :  { %v1018_v4 = vpop.f32.mrf.mxu0  ;;  %v1658_v63 = vld [vmem:[%s4065_s5 + $0x30] sm:$0xff]  ;;  %v1655_v2 = vld [vmem:[%s4065_s5 + $0x18] sm:$0xff] }
 0x14f   :  { %v1079_v5 = vpop.f32.mrf.mxu1  ;;  %v1115_v6 = vpack.c.bf16 %v1099_v54, %v1095_v53  ;;  %v1019_v7 = vadd.f32 %v1018_v4, %v199_v39  ;;  %v1078_v11 = vadd.f32 %v1077_v0, %v1017_v1  ;;  %v1102_v29 = vmax.f32 %v1076_v16, 0.0  ;;  %v1657_v0 = vld [vmem:[%s4065_s5 + $0x28] sm:$0xff]  ;;  %v1672_v53 = vld [vmem:[%s4065_s5 + $0xa0] sm:$0xff]  ;;  %v1671_v1 = vld [vmem:[%s4065_s5 + $0x98] sm:$0xff] }
 0x150   :  { %v1020_v9 = vpop.f32.mrf.mxu0  ;;  %v1656_v54 = vld [vmem:[%s4065_s5 + $0x20] sm:$0xff]  ;;  %v1670_v3 = vld [vmem:[%s4065_s5 + $0x90] sm:$0xff] }
 0x151   :  { %v1081_v10 = vpop.f32.mrf.mxu1  ;;  %v1080_v14 = vadd.f32 %v1079_v5, %v1019_v7  ;;  %v1021_v15 = vadd.f32 %v1020_v9, %v203_v12  ;;  %1613 = vmatprep.mubr.bf16.mxu1 %v1115_v6  ;;  %v1103_v25 = vmax.f32 %v1078_v11, 0.0  ;;  %v1654_v4 = vld [vmem:[%s4065_s5 + $0x10] sm:$0xff]  ;;  %v1669_v5 = vld [vmem:[%s4065_s5 + $0x88] sm:$0xff]  ;;  %v1668_v7 = vld [vmem:[%s4065_s5 + $0x80] sm:$0xff] }
 0x152   :  { %v1024_v17 = vpop.f32.mrf.mxu0  ;;  %1614 = vmatmul.mubr.bf16.vlgmr.msra.gmra.mxu1 %v1114_v8  ;;  %v1653_v6 = vld [vmem:[%s4065_s5 + $0x8] sm:$0xff]  ;;  %v1652_v8 = vld [vmem:[%s4065_s5] sm:$0xff] }
 0x153   :  { %v1085_v18 = vpop.f32.mrf.mxu1  ;;  %v1082_v19 = vadd.f32 %v1081_v10, %v1021_v15  ;;  %v1106_v20 = vmax.f32 %v1080_v14, 0.0  ;;  %v1025_v21 = vadd.f32 %v1024_v17, %v199_v39 }
 0x154   :  { %v1026_v22 = vpop.f32.mrf.mxu0 }
 0x155   :  { %v1087_v23 = vpop.f32.mrf.mxu1  ;;  %v1107_v26 = vmax.f32 %v1082_v19, 0.0  ;;  %v1027_v27 = vadd.f32 %v1026_v22, %v203_v12  ;;  %v1118_v35 = vpack.c.bf16 %v1106_v20, %v1102_v29  ;;  %v1086_v36 = vadd.f32 %v1085_v18, %v1025_v21  ;;  %v1683_v12 = vld [vmem:[%s4065_s5 + $0xf8] sm:$0xff] }
 0x156   :  { %v1028_v30 = vpop.f32.mrf.mxu0  ;;  %2569 = vmatprep.subr.mxu0 %v1683_v12  ;;  %2616 = vmatprep.subr.mxu1 %v1683_v12 }
 0x157   :  { %v1089_v31 = vpop.f32.mrf.mxu1  ;;  %v1119_v33 = vpack.c.bf16 %v1107_v26, %v1103_v25  ;;  %v1088_v34 = vadd.f32 %v1087_v23, %v1027_v27  ;;  %v1110_v28 = vmax.f32 %v1086_v36, 0.0  ;;  %2570 = vmatpush3.msra.mxu0 %v1667_v43  ;;  %2632 = vmatpush3.msra.mxu1 %v1667_v43  ;;  %v1188_v23 = vld [vmem:[%s4066_s4] sm:$0x3] }
 0x158   :  { %v1029_v37 = vpop.f32.mrf.mxu0  ;;  %2571 = vmatprep.subr.mxu0 %v1682_v44  ;;  %2617 = vmatprep.subr.mxu1 %v1682_v44  ;;  %v1193_v25 = vrot.slane %v1188_v23, %v3689_v42  ;;  %v1197_v26 = vrot.slane %v1188_v23, %v194_v40 }
 0x159   :  { %v1090_v24 = vpop.f32.mrf.mxu1  ;;  %v1111_v32 = vmax.f32 %v1088_v34, 0.0  ;;  %1623 = vmatprep.mubr.bf16.mxu1 %v1119_v33  ;;  %v1122_v39 = vpack.c.bf16 %v1110_v28, %v1110_v28  ;;  %2572 = vmatpush3.msra.mxu0 %v1666_v45 }
 0x15a   :  { %1624 = vmatmul.mubr.bf16.gmra.mxu1 %v1118_v35  ;;  %2573 = vmatprep.subr.mxu0 %v1681_v46 }
 0x15b   :  { %v1123_v13 = vpack.c.bf16 %v1111_v32, %v1111_v32  ;;  %2633 = vmatpush3.msra.mxu1 %v1666_v45  ;;  %2574 = vmatpush3.msra.mxu0 %v1665_v47 }
 0x15c   :  { %2618 = vmatprep.subr.mxu1 %v1681_v46  ;;  %2575 = vmatprep.subr.mxu0 %v1680_v48 }
 0x15d   :  { %1633 = vmatprep.mubr.bf16.mxu1 %v1123_v13  ;;  %2634 = vmatpush3.msra.mxu1 %v1665_v47 }
 0x15e   :  { %2576 = vmatpush3.msra.mxu0 %v1664_v49  ;;  %2619 = vmatprep.subr.mxu1 %v1680_v48 }
 0x15f   :  { %2577 = vmatprep.subr.mxu0 %v1679_v50  ;;  %2635 = vmatpush3.msra.mxu1 %v1664_v49 }
 0x160   :  { %2578 = vmatpush3.msra.mxu0 %v1663_v51  ;;  %2620 = vmatprep.subr.mxu1 %v1679_v50 }
 0x161   :  { %2579 = vmatprep.subr.mxu0 %v1678_v52  ;;  %2636 = vmatpush3.msra.mxu1 %v1663_v51 }
 0x162   :  { %1634 = vmatmul.mubr.bf16.gmra.mxu1 %v1122_v39  ;;  %2580 = vmatpush3.msra.mxu0 %v1662_v55 }
 0x163   :  { %2621 = vmatprep.subr.mxu1 %v1678_v52  ;;  %2581 = vmatprep.subr.mxu0 %v1677_v56 }
 0x164   :  { %2637 = vmatpush3.msra.mxu1 %v1662_v55  ;;  %2582 = vmatpush3.msra.mxu0 %v1661_v57 }
 0x165   :  { %2622 = vmatprep.subr.mxu1 %v1677_v56  ;;  %2583 = vmatprep.subr.mxu0 %v1676_v58 }
 0x166   :  { %2638 = vmatpush3.msra.mxu1 %v1661_v57  ;;  %2584 = vmatpush3.msra.mxu0 %v1660_v59 }
 0x167   :  { %2623 = vmatprep.subr.mxu1 %v1676_v58  ;;  %2585 = vmatprep.subr.mxu0 %v1675_v60 }
 0x168   :  { %2639 = vmatpush3.msra.mxu1 %v1660_v59  ;;  %2586 = vmatpush3.msra.mxu0 %v1659_v61 }
 0x169   :  { %2624 = vmatprep.subr.mxu1 %v1675_v60  ;;  %2587 = vmatprep.subr.mxu0 %v1674_v62 }
 0x16a   :  { %2640 = vmatpush3.msra.mxu1 %v1659_v61  ;;  %2588 = vmatpush3.msra.mxu0 %v1658_v63 }
 0x16b   :  { %2625 = vmatprep.subr.mxu1 %v1674_v62  ;;  %2589 = vmatprep.subr.mxu0 %v1673_v41 }
 0x16c   :  { %2641 = vmatpush3.msra.mxu1 %v1658_v63  ;;  %2590 = vmatpush3.msra.mxu0 %v1657_v0 }
 0x16d   :  { %2626 = vmatprep.subr.mxu1 %v1673_v41  ;;  %2591 = vmatprep.subr.mxu0 %v1672_v53 }
 0x16e   :  { %2642 = vmatpush3.msra.mxu1 %v1657_v0  ;;  %2592 = vmatpush3.msra.mxu0 %v1656_v54 }
 0x16f   :  { %2627 = vmatprep.subr.mxu1 %v1672_v53  ;;  %2593 = vmatprep.subr.mxu0 %v1671_v1 }
 0x170   :  { %2643 = vmatpush3.msra.mxu1 %v1656_v54  ;;  %2594 = vmatpush3.msra.mxu0 %v1655_v2 }
 0x171   :  { %2628 = vmatprep.subr.mxu1 %v1671_v1  ;;  %2595 = vmatprep.subr.mxu0 %v1670_v3 }
 0x172   :  { %2644 = vmatpush3.msra.mxu1 %v1655_v2  ;;  %2596 = vmatpush3.msra.mxu0 %v1654_v4 }
 0x173   :  { %2629 = vmatprep.subr.mxu1 %v1670_v3  ;;  %2597 = vmatprep.subr.mxu0 %v1669_v5 }
 0x174   :  { %2645 = vmatpush3.msra.mxu1 %v1654_v4  ;;  %2598 = vmatpush3.msra.mxu0 %v1653_v6 }
 0x175   :  { %2630 = vmatprep.subr.mxu1 %v1669_v5  ;;  %2599 = vmatprep.subr.mxu0 %v1668_v7 }
 0x176   :  { %2646 = vmatpush3.msra.mxu1 %v1653_v6  ;;  %2600 = vmatpush3.msra.mxu0 %v1652_v8 }
 0x177   :  { %2631 = vmatprep.subr.mxu1 %v1668_v7 }
 0x178   :  { %2647 = vmatpush3.msra.mxu1 %v1652_v8 }
 0x1d2   :  { %v1554_v9 = vpop.f32.mrf.mxu0 }
 0x1d3   :  { %v1555_v27 = vadd.f32 %v1554_v9, %v1193_v25 }
 0x1d4   :  { %v1556_v10 = vpop.f32.mrf.mxu0 }
 0x1d5   :  { %v1557_v30 = vadd.f32 %v1556_v10, %v1197_v26 }
 0x1d6   :  { %v1558_v11 = vpop.f32.mrf.mxu0 }
 0x1d7   :  { %v1559_v35 = vadd.f32 %v1558_v11, %v1193_v25 }
 0x1d8   :  { %v1560_v14 = vpop.f32.mrf.mxu0 }
 0x1d9   :  { %v1561_v37 = vadd.f32 %v1560_v14, %v1197_v26  ;;  %v2548_v14 = vld [vmem:[%s4067_s6] ss:$0 sm:$0xff] }
 0x1da   :  { %v1564_v15 = vpop.f32.mrf.mxu0 }
 0x1db   :  { %v1565_v12 = vadd.f32 %v1564_v15, %v1193_v25 }
 0x1dc   :  { %v1566_v16 = vpop.f32.mrf.mxu0 }
 0x1dd   :  { %v1567_v44 = vadd.f32 %v1566_v16, %v1197_v26 }
 0x1de   :  { %v1568_v17 = vpop.f32.mrf.mxu0 }
 0x1df   :  { %v1569_v49 = vadd.f32 %v1568_v17, %v1193_v25 }
 0x1e0   :  { %v1570_v18 = vpop.f32.mrf.mxu0 }
 0x1e1   :  { %v1571_v51 = vadd.f32 %v1570_v18, %v1197_v26 }
 0x1e2   :  { %v1574_v19 = vpop.f32.mrf.mxu0 }
 0x1e3   :  { %v1575_v59 = vadd.f32 %v1574_v19, %v1193_v25 }
 0x1e4   :  { %v1576_v20 = vpop.f32.mrf.mxu0 }
 0x1e5   :  { %v1577_v61 = vadd.f32 %v1576_v20, %v1197_v26 }
 0x1e6   :  { %v1578_v21 = vpop.f32.mrf.mxu0 }
 0x1e8   :  { %v1579_v22 = vpop.f32.mrf.mxu0 }
 0x212   :  { %v1615_v29 = vpop.f32.mrf.mxu1 }
 0x213   :  { %v1616_v31 = vadd.f32 %v1615_v29, %v1555_v27 }
 0x214   :  { %v1617_v33 = vpop.f32.mrf.mxu1 }
 0x215   :  { %v1618_v34 = vadd.f32 %v1617_v33, %v1557_v30  ;;  %v1642_v32 = vmax.f32 %v1616_v31, 0.0 }
 0x216   :  { %v1619_v36 = vpop.f32.mrf.mxu1 }
 0x217   :  { %v1643_v24 = vmax.f32 %v1618_v34, 0.0  ;;  %v1620_v13 = vadd.f32 %v1619_v36, %v1559_v35 }
 0x218   :  { %v1621_v28 = vpop.f32.mrf.mxu1 }
 0x219   :  { %v1622_v39 = vadd.f32 %v1621_v28, %v1561_v37  ;;  %1755 = vmatprep.mubr.f32.mxu0 %v1643_v24  ;;  %v1644_v45 = vmax.f32 %v1620_v13, 0.0 }
 0x21a   :  { %v1625_v43 = vpop.f32.mrf.mxu1  ;;  %1756 = vmatmul.mubr.f32.vlgmr.msra.gmra.mxu0 %v1642_v32 }
 0x21b   :  { %v1645_v40 = vmax.f32 %v1622_v39, 0.0  ;;  %v1626_v46 = vadd.f32 %v1625_v43, %v1565_v12 }
 0x21c   :  { %v1627_v47 = vpop.f32.mrf.mxu1 }
 0x21d   :  { %v1628_v48 = vadd.f32 %v1627_v47, %v1567_v44  ;;  %1760 = vmatprep.mubr.f32.mxu0 %v1645_v40  ;;  %v1646_v55 = vmax.f32 %v1626_v46, 0.0 }
 0x21e   :  { %v1629_v50 = vpop.f32.mrf.mxu1  ;;  %1761 = vmatmul.mubr.f32.gmra.mxu0 %v1644_v45 }
 0x21f   :  { %v1647_v52 = vmax.f32 %v1628_v48, 0.0  ;;  %v1630_v56 = vadd.f32 %v1629_v50, %v1569_v49 }
 0x220   :  { %v1631_v57 = vpop.f32.mrf.mxu1 }
 0x221   :  { %v1632_v58 = vadd.f32 %v1631_v57, %v1571_v51  ;;  %1765 = vmatprep.mubr.f32.mxu0 %v1647_v52  ;;  %v1648_v63 = vmax.f32 %v1630_v56, 0.0 }
 0x222   :  { %v1635_v60 = vpop.f32.mrf.mxu1  ;;  %1766 = vmatmul.mubr.f32.gmra.mxu0 %v1646_v55 }
 0x223   :  { %v1649_v62 = vmax.f32 %v1632_v58, 0.0  ;;  %v1636_v41 = vadd.f32 %v1635_v60, %v1575_v59 }
 0x224   :  { %v1637_v0 = vpop.f32.mrf.mxu1 }
 0x225   :  { %v1638_v53 = vadd.f32 %v1637_v0, %v1577_v61  ;;  %1770 = vmatprep.mubr.f32.mxu1 %v1649_v62  ;;  %v1650_v2 = vmax.f32 %v1636_v41, 0.0 }
 0x226   :  { %v1639_v54 = vpop.f32.mrf.mxu1  ;;  %1771 = vmatmul.mubr.f32.vlgmr.msra.gmra.mxu1 %v1648_v63 }
 0x227   :  { %v1651_v1 = vmax.f32 %v1638_v53, 0.0 }
 0x228   :  { %v1640_v3 = vpop.f32.mrf.mxu1 }
 0x229   :  { %1775 = vmatprep.mubr.f32.mxu1 %v1651_v1 }
 0x22a   :  { %1776 = vmatmul.mubr.f32.gmra.mxu1 %v1650_v2  ;;  %v2955_v2 = vmov 1966171168  }
 0x22b   :  { %v1850_v3 = vunpack.c.l.s4 %v2955_v2 }
 0x2da   :  { %v2601_v4 = vpop.f32.mrf.mxu0 }
 0x2dc   :  { %v2602_v5 = vpop.f32.mrf.mxu0 }
 0x2dd   :  { %v2603_v18 = vadd.f32 %v2602_v5, %v2601_v4  ;;  %v1851_v4 = vunpack.c.0.s8 %v1850_v3 }
 0x2de   :  { %v2604_v6 = vpop.f32.mrf.mxu0 }
 0x2df   :  { %v1758_v26 = vadd.f32 %v2603_v18, %v2548_v14  ;;  %v3818_v5 = vsub.s32 %v1851_v4, %v3680_v38 }
 0x2e0   :  { %v2605_v7 = vpop.f32.mrf.mxu0 }
 0x2e1   :  { %v2606_v27 = vadd.f32 %v2605_v7, %v2604_v6 }
 0x2e2   :  { %v2607_v8 = vpop.f32.mrf.mxu0 }
 0x2e3   :  { %v1763_v34 = vadd.f32 %v2606_v27, %v2548_v14 }
 0x2e4   :  { %v2608_v9 = vpop.f32.mrf.mxu0 }
 0x2e5   :  { %v2609_v10 = vadd.f32 %v2608_v9, %v2607_v8 }
 0x2e6   :  { %v2610_v11 = vpop.f32.mrf.mxu1 }
 0x2e7   :  { %v1768_v16 = vadd.f32 %v2609_v10, %v2548_v14 }
 0x2e8   :  { %v2611_v15 = vpop.f32.mrf.mxu1 }
 0x2e9   :  { %v2612_v17 = vadd.f32 %v2611_v15, %v2610_v11  ;;  %v1785_v22 = vrot.slane %v1768_v16, 4 }
 0x2ea   :  { %v2613_v19 = vpop.f32.mrf.mxu1 }
 0x2eb   :  { %v1773_v20 = vadd.f32 %v2612_v17, %v2548_v14 }
 0x2ec   :  { %v2614_v21 = vpop.f32.mrf.mxu1 }
 0x2ed   :  { %v1786_v23 = vrot.slane %v1773_v20, 4  ;;  %v2615_v25 = vadd.f32 %v2614_v21, %v2613_v19 }
 0x2ef   :  { %v1787_v29 = vsel %vm1784_vm0, %v1785_v22, %v1786_v23  ;;  %v1778_v30 = vadd.f32 %v2615_v25, %v2548_v14 }
 0x2f0   :  { %v1793_v31 = vmax.f32 %v1758_v26, %v1787_v29 }
 0x2f1   :  { %v1788_v33 = vrot.slane %v1778_v30, 4 }
 0x2f2   :  { %v1808_v35 = vrot.slane %v1793_v31, 4  ;;  %v1796_v39 = vsub.f32 %v1758_v26, %v1793_v31 }
 0x2f3   :  { %v1789_v36 = vsel %vm1784_vm0, %v1786_v23, %v1788_v33  ;;  %v1795_v37 = vmax.f32 %v1768_v16, %v1788_v33 }
 0x2f4   :  { %v1816_v24 = vsub.f32 %v1768_v16, %v1808_v35  ;;  %v1794_v32 = vmax.f32 %v1763_v34, %v1789_v36  ;;  %v1799_v48 = vmul.f32 1.442695, %v1796_v39 }
 0x2f5   :  { %v1811_v13 = vrot.slane %v1795_v37, 4  ;;  %v1798_v43 = vsub.f32 %v1768_v16, %v1795_v37 }
 0x2f6   :  { %v1809_v28 = vrot.slane %v1794_v32, 4  ;;  %v1819_v12 = vmul.f32 1.442695, %v1816_v24  ;;  %v1797_v45 = vsub.f32 %v1763_v34, %v1794_v32 }
 0x2f7   :  { %v1803_v51 = vmul.f32 1.442695, %v1798_v43 }
 0x2f8   :  { %v1810_v44 = vsel %vm1784_vm0, %v1808_v35, %v1809_v28  ;;  %v1812_v40 = vsel %vm1784_vm0, %v1809_v28, %v1811_v13  ;;  %2937 = vpow2.f32 %v1819_v12  ;;  %v1801_v52 = vmul.f32 1.442695, %v1797_v45 }
 0x2f9   :  { %v1817_v46 = vsub.f32 %v1773_v20, %v1810_v44  ;;  %v1818_v47 = vsub.f32 %v1778_v30, %v1812_v40 }
 0x2fb   :  { %v1821_v49 = vmul.f32 1.442695, %v1817_v46  ;;  %v1823_v50 = vmul.f32 1.442695, %v1818_v47 }
 0x2fd   :  { %2939 = vpow2.f32 %v1821_v49 }
 0x2fe   :  { %2941 = vpow2.f32 %v1823_v50 }
 0x2ff   :  { %2943 = vpow2.f32 %v1799_v48 }
 0x300   :  { %2945 = vpow2.f32 %v1803_v51 }
 0x301   :  { %2947 = vpow2.f32 %v1801_v52 }
 0x305   :  { %v2938_v55 = vpop.eup %2937 }
 0x306   :  { %v1828_v58 = vrot.slane %v2938_v55, 4 }
 0x30a   :  { %v3809_v56 = vpop.eup %2939 }
 0x30b   :  { %v3811_v57 = vpop.eup %2941  ;;  %v1829_v59 = vrot.slane %v3809_v56, 4 }
 0x30c   :  { %v2944_v60 = vpop.eup %2943  ;;  %v1831_v61 = vrot.slane %v3811_v57, 4 }
 0x30d   :  { %v2946_v62 = vpop.eup %2945  ;;  %v1830_v63 = vsel %vm1784_vm0, %v1828_v58, %v1829_v59 }
 0x30e   :  { %v2948_v41 = vpop.eup %2947  ;;  %v1832_v0 = vsel %vm1784_vm0, %v1829_v59, %v1831_v61  ;;  %v1836_v53 = vadd.f32 %v2944_v60, %v1830_v63  ;;  %v1838_v54 = vadd.f32 %v2946_v62, %v1831_v61 }
 0x30f   :  { %v1837_v1 = vadd.f32 %v2948_v41, %v1832_v0 }
 0x310   :  { %2949 = vrcp.f32 %v1836_v53 }
 0x311   :  { %2951 = vrcp.f32 %v1837_v1 }
 0x312   :  { %2953 = vrcp.f32 %v1838_v54 }
 0x31d   :  { %v2950_v6 = vpop.eup %2949 }
 0x31e   :  { %v2952_v7 = vpop.eup %2951  ;;  %v1842_v8 = vmul.f32 %v2950_v6, %v2944_v60  ;;  %v2094_v9 = vrot.slane %v2950_v6, 4 }
 0x31f   :  { %v2954_v10 = vpop.eup %2953  ;;  %v1843_v11 = vmul.f32 %v2952_v7, %v2948_v41  ;;  %v2095_v14 = vrot.slane %v2952_v7, 4 }
 0x320   :  { %v1844_v15 = vmul.f32 %v2954_v10, %v2946_v62  ;;  %v1848_v16 = vcombine.high %v1842_v8, %v1842_v8  ;;  %v1855_v17 = vrot.slane %v1842_v8, %v3818_v5  ;;  %v2097_v18 = vrot.slane %v2954_v10, 4 }
 0x321   :  { %v1897_v19 = vcombine.high %v1843_v11, %v1843_v11  ;;  %v1904_v20 = vrot.slane %v1843_v11, %v3818_v5  ;;  %v3823_v21 = vsel %vm1784_vm0, %v2094_v9, %v2095_v14  ;;  %v3825_v38 = vmul.f32 %v2938_v55, %v2094_v9 }
 0x322   :  { %v1862_v22 = vrot.slane %v1848_v16, %v3818_v5  ;;  %v1863_v23 = vcombine.high %v1855_v17, %v1855_v17  ;;  %v1871_v25 = vrot.slane %v1855_v17, %v3818_v5  ;;  %v1952_v26 = vrot.slane %v1844_v15, %v3818_v5 }
 0x323   :  { %v1911_v27 = vrot.slane %v1897_v19, %v3818_v5  ;;  %v1912_v29 = vcombine.high %v1904_v20, %v1904_v20  ;;  %v1920_v30 = vrot.slane %v1904_v20, %v3818_v5  ;;  %v2098_v31 = vsel %vm1784_vm0, %v2095_v14, %v2097_v18 }
 0x324   :  { %v1864_v33 = vcombine.high %v1862_v22, %v1862_v22  ;;  %v1878_v34 = vrot.slane %v1862_v22, %v3818_v5  ;;  %v1885_v35 = vrot.slane %v1863_v23, %v3818_v5  ;;  %v1893_v36 = vcombine.high %v1871_v25, %v1871_v25 }
 0x325   :  { %v1913_v37 = vcombine.high %v1911_v27, %v1911_v27  ;;  %v1927_v24 = vrot.slane %v1911_v27, %v3818_v5  ;;  %v1934_v32 = vrot.slane %v1912_v29, %v3818_v5  ;;  %v1942_v13 = vcombine.high %v1920_v30, %v1920_v30 }
 0x326   :  { %v1892_v28 = vrot.slane %v1864_v33, %v3818_v5  ;;  %v1894_v39 = vcombine.high %v1878_v34, %v1878_v34  ;;  %v1895_v12 = vcombine.high %v1885_v35, %v1885_v35  ;;  %v1953_v43 = vcombine.high %v1952_v26, %v1952_v26 }
 0x327   :  { %v1941_v44 = vrot.slane %v1913_v37, %v3818_v5  ;;  %v1943_v40 = vcombine.high %v1927_v24, %v1927_v24  ;;  %v1944_v45 = vcombine.high %v1934_v32, %v1934_v32  ;;  %v1960_v46 = vrot.slane %v1952_v26, %v3818_v5 }
 0x328   :  { %v1896_v47 = vcombine.high %v1892_v28, %v1892_v28  ;;  %v1967_v48 = vrot.slane %v1953_v43, %v3818_v5  ;;  %v1973_v49 = vrot.slane %v1871_v25, %v3689_v42  ;;  %v1977_v50 = vrot.slane %v1885_v35, %v3689_v42 }
 0x329   :  { %v1945_v51 = vcombine.high %v1941_v44, %v1941_v44  ;;  %v1968_v52 = vcombine.high %v1960_v46, %v1960_v46  ;;  %v1981_v55 = vrot.slane %v1893_v36, %v3689_v42  ;;  %v1985_v58 = vrot.slane %v1895_v12, %v3689_v42 }
 0x32a   :  { %v1969_v59 = vcombine.high %v1967_v48, %v1967_v48  ;;  %v1989_v60 = vrot.slane %v1878_v34, %v3689_v42  ;;  %v1993_v61 = vrot.slane %v1892_v28, %v3689_v42  ;;  %v1997_v62 = vrot.slane %v1894_v39, %v3689_v42  ;;  %2071 = vst.msk [vmem:[%s4068_s7] sm:$0xff] %vm2070_vm1, %v1973_v49 }
 0x32b   :  { %2072 = vst.msk [vmem:[%s4068_s7 + $0x8] sm:$0xff] %vm2070_vm1, %v1977_v50  ;;  %v2001_v63 = vrot.slane %v1896_v47, %v3689_v42  ;;  %v2005_v41 = vrot.slane %v1920_v30, %v3689_v42  ;;  %v2009_v0 = vrot.slane %v1934_v32, %v3689_v42  ;;  %v2013_v53 = vrot.slane %v1942_v13, %v3689_v42 }
 0x32c   :  { %2073 = vst.msk [vmem:[%s4068_s7 + $0x10] sm:$0xff] %vm2070_vm1, %v1981_v55  ;;  %2074 = vst.msk [vmem:[%s4068_s7 + $0x18] sm:$0xff] %vm2070_vm1, %v1985_v58  ;;  %v2017_v54 = vrot.slane %v1944_v45, %v3689_v42  ;;  %v2021_v1 = vrot.slane %v1927_v24, %v3689_v42  ;;  %v2025_v2 = vrot.slane %v1941_v44, %v3689_v42 }
 0x32d   :  { %v2029_v3 = vrot.slane %v1943_v40, %v3689_v42  ;;  %2075 = vst.msk [vmem:[%s4068_s7 + $0x20] sm:$0xff] %vm2070_vm1, %v1989_v60  ;;  %2076 = vst.msk [vmem:[%s4068_s7 + $0x28] sm:$0xff] %vm2070_vm1, %v1993_v61  ;;  %v2033_v4 = vrot.slane %v1945_v51, %v3689_v42  ;;  %v2037_v6 = vrot.slane %v1960_v46, %v3689_v42 }
 0x32e   :  { %2077 = vst.msk [vmem:[%s4068_s7 + $0x30] sm:$0xff] %vm2070_vm1, %v1997_v62  ;;  %v2041_v7 = vrot.slane %v1967_v48, %v3689_v42  ;;  %v2045_v8 = vrot.slane %v1968_v52, %v3689_v42  ;;  %2078 = vst.msk [vmem:[%s4068_s7 + $0x38] sm:$0xff] %vm2070_vm1, %v2001_v63  ;;  %v2049_v9 = vrot.slane %v1969_v59, %v3689_v42 }
 0x32f   :  { %2079 = vst.msk [vmem:[%s4068_s7 + $0x40] sm:$0xff] %vm2070_vm1, %v2005_v41  ;;  %2080 = vst.msk [vmem:[%s4068_s7 + $0x48] sm:$0xff] %vm2070_vm1, %v2009_v0  ;;  %v2103_v10 = vmul.f32 %v3809_v56, %v3823_v21  ;;  %v2104_v11 = vmul.f32 %v3811_v57, %v2098_v31  ;;  %v2108_v14 = vcombine.high %v3825_v38, %v3825_v38 }
 0x330   :  { %2081 = vst.msk [vmem:[%s4068_s7 + $0x50] sm:$0xff] %vm2070_vm1, %v2013_v53  ;;  %2082 = vst.msk [vmem:[%s4068_s7 + $0x58] sm:$0xff] %vm2070_vm1, %v2017_v54 }
 0x331   :  { %2083 = vst.msk [vmem:[%s4068_s7 + $0x60] sm:$0xff] %vm2070_vm1, %v2021_v1  ;;  %2084 = vst.msk [vmem:[%s4068_s7 + $0x68] sm:$0xff] %vm2070_vm1, %v2025_v2  ;;  %v2115_v56 = vrot.slane %v2108_v14, %v3818_v5  ;;  %v2133_v57 = vcombine.high %v2103_v10, %v2103_v10  ;;  %v2140_v15 = vrot.slane %v2103_v10, %v3818_v5 }
 0x332   :  { %2085 = vst.msk [vmem:[%s4068_s7 + $0x70] sm:$0xff] %vm2070_vm1, %v2029_v3  ;;  %2086 = vst.msk [vmem:[%s4068_s7 + $0x78] sm:$0xff] %vm2070_vm1, %v2033_v4  ;;  %v2182_v16 = vcombine.high %v2104_v11, %v2104_v11  ;;  %v2189_v17 = vrot.slane %v2104_v11, %v3818_v5 }
 0x333   :  { %2087 = vst.msk [vmem:[%s4068_s7 + $0x80] sm:$0xff] %vm2070_vm1, %v2037_v6  ;;  %2088 = vst.msk [vmem:[%s4068_s7 + $0x88] sm:$0xff] %vm2070_vm1, %v2041_v7  ;;  %v2116_v18 = vcombine.high %v2115_v56, %v2115_v56  ;;  %v2123_v19 = vrot.slane %v2115_v56, %v3818_v5  ;;  %v2147_v20 = vrot.slane %v2133_v57, %v3818_v5 }
 0x334   :  { %2089 = vst.msk [vmem:[%s4068_s7 + $0x90] sm:$0xff] %vm2070_vm1, %v2045_v8  ;;  %2090 = vst.msk [vmem:[%s4068_s7 + $0x98] sm:$0xff] %vm2070_vm1, %v2049_v9  ;;  %v2148_v21 = vcombine.high %v2140_v15, %v2140_v15  ;;  %v2156_v38 = vrot.slane %v2140_v15, %v3818_v5  ;;  %v2196_v22 = vrot.slane %v2182_v16, %v3818_v5 }
 0x335   :  { %v2197_v23 = vcombine.high %v2189_v17, %v2189_v17  ;;  %v2205_v25 = vrot.slane %v2189_v17, %v3818_v5  ;;  %v2130_v26 = vrot.slane %v2116_v18, %v3818_v5  ;;  %v2131_v27 = vcombine.high %v2123_v19, %v2123_v19 }
 0x336   :  { %v2149_v29 = vcombine.high %v2147_v20, %v2147_v20  ;;  %v2163_v30 = vrot.slane %v2147_v20, %v3818_v5  ;;  %v2170_v31 = vrot.slane %v2148_v21, %v3818_v5  ;;  %v2178_v33 = vcombine.high %v2156_v38, %v2156_v38 }
 0x337   :  { %v2198_v34 = vcombine.high %v2196_v22, %v2196_v22  ;;  %v2212_v35 = vrot.slane %v2196_v22, %v3818_v5  ;;  %v2132_v36 = vcombine.high %v2130_v26, %v2130_v26  ;;  %v2219_v32 = vrot.slane %v2197_v23, %v3818_v5 }
 0x338   :  { %v2177_v37 = vrot.slane %v2149_v29, %v3818_v5  ;;  %v2179_v24 = vcombine.high %v2163_v30, %v2163_v30  ;;  %v2180_v13 = vcombine.high %v2170_v31, %v2170_v31  ;;  %v2227_v39 = vcombine.high %v2205_v25, %v2205_v25 }
 0x339   :  { %v2226_v28 = vrot.slane %v2198_v34, %v3818_v5  ;;  %v2228_v12 = vcombine.high %v2212_v35, %v2212_v35  ;;  %v2229_v44 = vcombine.high %v2219_v32, %v2219_v32  ;;  %v2234_v40 = vrot.slane %v2123_v19, %v3689_v42 }
 0x33a   :  { %v2181_v43 = vcombine.high %v2177_v37, %v2177_v37  ;;  %v2238_v45 = vrot.slane %v2130_v26, %v3689_v42  ;;  %v2242_v47 = vrot.slane %v2131_v27, %v3689_v42  ;;  %v2246_v48 = vrot.slane %v2132_v36, %v3689_v42 }
 0x33b   :  { %v2230_v46 = vcombine.high %v2226_v28, %v2226_v28  ;;  %v2250_v49 = vrot.slane %v2156_v38, %v3689_v42  ;;  %v2254_v50 = vrot.slane %v2170_v31, %v3689_v42  ;;  %v2258_v51 = vrot.slane %v2178_v33, %v3689_v42  ;;  %2549 = vst.msk [vmem:[%s4068_s7 + $0xa0] sm:$0xff] %vm2070_vm1, %v2234_v40 }
 0x33c   :  { %v2262_v5 = vrot.slane %v2180_v13, %v3689_v42  ;;  %v2266_v52 = vrot.slane %v2163_v30, %v3689_v42  ;;  %2550 = vst.msk [vmem:[%s4068_s7 + $0xa8] sm:$0xff] %vm2070_vm1, %v2238_v45  ;;  %v2270_v55 = vrot.slane %v2177_v37, %v3689_v42  ;;  %v2274_v58 = vrot.slane %v2179_v24, %v3689_v42 }
 0x33d   :  { %v2278_v59 = vrot.slane %v2181_v43, %v3689_v42  ;;  %v2282_v60 = vrot.slane %v2205_v25, %v3689_v42  ;;  %2551 = vst.msk [vmem:[%s4068_s7 + $0xb0] sm:$0xff] %vm2070_vm1, %v2242_v47  ;;  %2552 = vst.msk [vmem:[%s4068_s7 + $0xb8] sm:$0xff] %vm2070_vm1, %v2246_v48  ;;  %v2286_v61 = vrot.slane %v2219_v32, %v3689_v42 }
 0x33e   :  { %2553 = vst.msk [vmem:[%s4068_s7 + $0xc0] sm:$0xff] %vm2070_vm1, %v2250_v49  ;;  %v2290_v62 = vrot.slane %v2227_v39, %v3689_v42  ;;  %v2294_v63 = vrot.slane %v2229_v44, %v3689_v42  ;;  %v2298_v41 = vrot.slane %v2212_v35, %v3689_v42  ;;  %2554 = vst.msk [vmem:[%s4068_s7 + $0xc8] sm:$0xff] %vm2070_vm1, %v2254_v50 }
 0x33f   :  { %2555 = vst.msk [vmem:[%s4068_s7 + $0xd0] sm:$0xff] %vm2070_vm1, %v2258_v51  ;;  %2556 = vst.msk [vmem:[%s4068_s7 + $0xd8] sm:$0xff] %vm2070_vm1, %v2262_v5  ;;  %v2302_v0 = vrot.slane %v2226_v28, %v3689_v42  ;;  %v2306_v53 = vrot.slane %v2228_v12, %v3689_v42  ;;  %v2310_v54 = vrot.slane %v2230_v46, %v3689_v42 }
 0x340   :  { %2557 = vst.msk [vmem:[%s4068_s7 + $0xe0] sm:$0xff] %vm2070_vm1, %v2266_v52  ;;  %2558 = vst.msk [vmem:[%s4068_s7 + $0xe8] sm:$0xff] %vm2070_vm1, %v2270_v55 }
 0x341   :  { %2559 = vst.msk [vmem:[%s4068_s7 + $0xf0] sm:$0xff] %vm2070_vm1, %v2274_v58  ;;  %2560 = vst.msk [vmem:[%s4068_s7 + $0xf8] sm:$0xff] %vm2070_vm1, %v2278_v59 }
 0x342   :  { %2561 = vst.msk [vmem:[%s4068_s7 + $0x100] sm:$0xff] %vm2070_vm1, %v2282_v60  ;;  %2562 = vst.msk [vmem:[%s4068_s7 + $0x108] sm:$0xff] %vm2070_vm1, %v2286_v61 }
 0x343   :  { %2563 = vst.msk [vmem:[%s4068_s7 + $0x110] sm:$0xff] %vm2070_vm1, %v2290_v62  ;;  %2564 = vst.msk [vmem:[%s4068_s7 + $0x118] sm:$0xff] %vm2070_vm1, %v2294_v63 }
 0x344   :  { %2565 = vst.msk [vmem:[%s4068_s7 + $0x120] sm:$0xff] %vm2070_vm1, %v2298_v41  ;;  %2566 = vst.msk [vmem:[%s4068_s7 + $0x128] sm:$0xff] %vm2070_vm1, %v2302_v0 }
 0x345   :  { %2567 = vst.msk [vmem:[%s4068_s7 + $0x130] sm:$0xff] %vm2070_vm1, %v2306_v53  ;;  %2568 = vst.msk [vmem:[%s4068_s7 + $0x138] sm:$0xff] %vm2070_vm1, %v2310_v54 }

</bundles_post_ra>
